<compile_context>
chip_gen: v7x
topology: tpu7x:2x2x1
jax: 0.10.0
libtpu: 0.0.40
codegen_flags: <defaults>
</compile_context>

<pallas_src>
import math
import functools

import jax
import jax.numpy as jnp
import numpy as np
from jax import lax
from jax.experimental import pallas as pl
from jax.experimental.pallas import tpu as pltpu

LN_EPS = 1e-7                      # DebertaV2 layer_norm_eps default
MASK_NEG = 1e30                    # finite additive-mask magnitude (f32 safe)
VMEM_LIMIT = 48 * 1024 * 1024      # above default scoped limit, below physical


# ----------------------------- in-kernel helpers -----------------------------

def _layernorm(y, gamma, beta):
    # One-pass statistics: var = E[y^2] - mean^2 (saves one full (S,H) VPU pass).
    mu = jnp.mean(y, axis=-1, keepdims=True)
    ms = jnp.mean(y * y, axis=-1, keepdims=True)
    inv = lax.rsqrt(ms - mu * mu + LN_EPS)
    return (y - mu) * inv * gamma + beta


def _erf(x):
    # Abramowitz & Stegun 7.1.26 polynomial, |err| < 1.5e-7.  Uses only
    # mul/add/div/exp (VPU + EUP), so it always lowers on Mosaic.
    a1, a2, a3 = 0.254829592, -0.284496736, 1.421413741
    a4, a5, p = -1.453152027, 1.061405429, 0.3275911
    sgn = jnp.where(x >= 0.0, 1.0, -1.0)
    ax = jnp.abs(x)
    t = 1.0 / (1.0 + p * ax)
    poly = ((((a5 * t + a4) * t + a3) * t + a2) * t + a1) * t
    return sgn * (1.0 - poly * jnp.exp(-ax * ax))


def _gelu_exact(x):
    # transformers ACT2FN["gelu"] == exact erf GELU
    return 0.5 * x * (1.0 + _erf(x * (1.0 / math.sqrt(2.0))))


def _seq_tile(S):
    # Sequence tile: multiple of 8 sublanes, or the full (small) sequence.
    for t in (256, 128):
        if S % t == 0 and S > t:
            return t
    return S


def _int_tile(I):
    # Intermediate-dim tile: multiple of 128 lanes, or the full (small) dim.
    for t in (512, 256, 128):
        if I % t == 0 and I > t:
            return t
    return I


def _const_spec(shape, grid_rank):
    zeros = (0,) * len(shape)
    if grid_rank == 2:
        return pl.BlockSpec(shape, lambda b, q: zeros)
    return pl.BlockSpec(shape, lambda b, s, i: zeros)


# ------------------------------ attention kernel -----------------------------

def attention_kernel(num_heads,
                     xq_ref, xfull_ref, mq_ref, mk_ref,
                     wq_ref, bq_ref, wk_ref, bk_ref, wv_ref, bv_ref,
                     wo_ref, bo_ref, gamma_ref, beta_ref,
                     out_ref,
                     k_sc, v_sc):
    H = xfull_ref.shape[2]
    dh = H // num_heads
    scale = 1.0 / math.sqrt(dh)                    # scale_factor == 1 (no rel. attn)

    # K/V for the full sequence, computed once per batch element (first q-tile),
    # cached per head in VMEM scratch in bf16.
    @pl.when(pl.program_id(1) == 0)
    def _():
        xb = xfull_ref[0].astype(jnp.bfloat16)                       # (S, H)
        for h in range(num_heads):
            k = jnp.dot(xb, wk_ref[h],
                        preferred_element_type=jnp.float32) + bk_ref[h]
            v = jnp.dot(xb, wv_ref[h],
                        preferred_element_type=jnp.float32) + bv_ref[h]
            k_sc[h] = k.astype(jnp.bfloat16)
            v_sc[h] = v.astype(jnp.bfloat16)

    xq = xq_ref[0]                                 # (TS, H) f32 residual input
    xqb = xq.astype(jnp.bfloat16)
    mq = mq_ref[0]                                 # (TS, 1) query-row mask
    mk = mk_ref[0]                                 # (1, S)  key mask
    # Additive mask bias: 0 where both kept, -1e30 otherwise (pure arithmetic).
    bias = (mq * mk - 1.0) * MASK_NEG              # (TS, S)

    # Residual + output-projection bias folded into the f32 accumulator.
    acc = xq + bo_ref[...]                         # (TS, H)
    for h in range(num_heads):
        q = jnp.dot(xqb, wq_ref[h],
                    preferred_element_type=jnp.float32) + bq_ref[h]  # (TS, dh)
        q = (q * scale).astype(jnp.bfloat16)
        # scores = Q @ K^T without materializing a transpose.
        s = lax.dot_general(q, k_sc[h], (((1,), (1,)), ((), ())),
                            preferred_element_type=jnp.float32)      # (TS, S)
        s = s + bias
        s = s - jnp.max(s, axis=-1, keepdims=True)
        e = jnp.exp(s)
        p = e * pl.reciprocal(jnp.sum(e, axis=-1, keepdims=True), approx=True)
        ctx = jnp.dot(p.astype(jnp.bfloat16), v_sc[h],
                      preferred_element_type=jnp.float32)            # (TS, dh)
        # XSoftmax semantics: fully padded query rows produce zero context.
        ctx = ctx * mq
        acc = acc + jnp.dot(ctx.astype(jnp.bfloat16), wo_ref[h],
                            preferred_element_type=jnp.float32)

    # DebertaV2SelfOutput: dense (+bias, folded above) + (dropout=id) + LayerNorm(residual)
    out_ref[0] = _layernorm(acc, gamma_ref[...], beta_ref[...])


# --------------------------------- FFN kernel --------------------------------

def ffn_kernel(x_ref, w1_ref, b1_ref, w2_ref, b2_ref, gamma_ref, beta_ref,
               out_ref, acc_ref):
    ki = pl.program_id(2)

    @pl.when(ki == 0)
    def _():
        acc_ref[...] = jnp.zeros_like(acc_ref)

    x = x_ref[0]                                   # (TS, H) f32
    # DebertaV2Intermediate (tile of the intermediate dim): dense + gelu
    h = jnp.dot(x.astype(jnp.bfloat16), w1_ref[...],
                preferred_element_type=jnp.float32) + b1_ref[...]
    h = _gelu_exact(h)
    # Partial product of DebertaV2Output dense, accumulated over I tiles.
    acc_ref[...] += jnp.dot(h.astype(jnp.bfloat16), w2_ref[...],
                            preferred_element_type=jnp.float32)

    @pl.when(ki == pl.num_programs(2) - 1)
    def _():
        # DebertaV2Output: + bias + (dropout=id) + LayerNorm(residual)
        y = acc_ref[...] + b2_ref[...] + x
        out_ref[0] = _layernorm(y, gamma_ref[...], beta_ref[...])


# --------------------------------- wrappers -----------------------------------

def attention_block(x, attention_mask, p):
    B, S, H = x.shape
    nh = p["num_heads"]
    dh = H // nh
    TS = _seq_tile(S)
    mask_q = attention_mask.reshape(B, S, 1).astype(jnp.float32)
    mask_k = attention_mask.reshape(B, 1, S).astype(jnp.float32)
    kernel = functools.partial(attention_kernel, nh)
    return pl.pallas_call(
        kernel,
        out_shape=jax.ShapeDtypeStruct((B, S, H), jnp.float32),
        grid=(B, S // TS),
        in_specs=[
            pl.BlockSpec((1, TS, H), lambda b, q: (b, q, 0)),        # query tile
            pl.BlockSpec((1, S, H), lambda b, q: (b, 0, 0)),         # full seq (K/V src)
            pl.BlockSpec((1, TS, 1), lambda b, q: (b, q, 0)),        # query-row mask
            pl.BlockSpec((1, 1, S), lambda b, q: (b, 0, 0)),         # key mask
            _const_spec((nh, H, dh), 2), _const_spec((nh, 1, dh), 2),   # Wq, bq
            _const_spec((nh, H, dh), 2), _const_spec((nh, 1, dh), 2),   # Wk, bk
            _const_spec((nh, H, dh), 2), _const_spec((nh, 1, dh), 2),   # Wv, bv
            _const_spec((nh, dh, H), 2), _const_spec((1, H), 2),        # Wo, bo
            _const_spec((1, H), 2), _const_spec((1, H), 2),             # LN gamma, beta
        ],
        out_specs=pl.BlockSpec((1, TS, H), lambda b, q: (b, q, 0)),
        scratch_shapes=[pltpu.VMEM((nh, S, dh), jnp.bfloat16),       # K cache
                        pltpu.VMEM((nh, S, dh), jnp.bfloat16)],      # V cache
        compiler_params=pltpu.CompilerParams(
            dimension_semantics=("parallel", "arbitrary"),
            vmem_limit_bytes=VMEM_LIMIT),
    )(x, x, mask_q, mask_k,
      p["wq"], p["bq"], p["wk"], p["bk"], p["wv"], p["bv"],
      p["wo"], p["bo"], p["ln_attn_g"], p["ln_attn_b"])


def ffn_block(x, p):
    B, S, H = x.shape
    I = p["w1"].shape[1]
    TS = _seq_tile(S)
    TI = _int_tile(I)
    return pl.pallas_call(
        ffn_kernel,
        out_shape=jax.ShapeDtypeStruct((B, S, H), jnp.float32),
        grid=(B, S // TS, I // TI),
        in_specs=[
            pl.BlockSpec((1, TS, H), lambda b, s, i: (b, s, 0)),
            pl.BlockSpec((H, TI), lambda b, s, i: (0, i)),           # W1 tile
            pl.BlockSpec((1, TI), lambda b, s, i: (0, i)),           # b1 tile
            pl.BlockSpec((TI, H), lambda b, s, i: (i, 0)),           # W2 tile
            _const_spec((1, H), 3),                                  # b2
            _const_spec((1, H), 3), _const_spec((1, H), 3),          # LN gamma, beta
        ],
        out_specs=pl.BlockSpec((1, TS, H), lambda b, s, i: (b, s, 0)),
        scratch_shapes=[pltpu.VMEM((TS, H), jnp.float32)],           # f32 accumulator
        compiler_params=pltpu.CompilerParams(
            dimension_semantics=("parallel", "parallel", "arbitrary"),
            vmem_limit_bytes=VMEM_LIMIT),
    )(x, p["w1"], p["b1"], p["w2"], p["b2"], p["ln_out_g"], p["ln_out_b"])


def deberta_v2_dropped_layer(params, hidden_states, attention_mask,
                             drop_attn=False, drop_mlp=False,
                             query_states=None, relative_pos=None,
                             rel_embeddings=None, output_attentions=False):
    """Forward of DebertaV2DroppedLayer for one layer_index.

    drop_attn / drop_mlp correspond to config.drop_attn_list[layer_index] /
    config.drop_mlp_list[layer_index].
    """
    x = hidden_states
    if not drop_attn:
        x = attention_block(x, attention_mask, params)
    if not drop_mlp:
        x = ffn_block(x, params)
    if output_attentions:
        return x, None      # TODO(synk): att_matrix not computed in the kernel path
    return x


# ------------------------------ parameters ------------------------------------

def init_raw_params(key, hidden, intermediate, num_heads, scale=0.02):
    ks = jax.random.split(key, 14)
    f32 = jnp.float32
    n = lambda k, shp: scale * jax.random.normal(k, shp, f32)
    return {
        "num_heads": num_heads,
        "wq": n(ks[0], (hidden, hidden)), "bq": n(ks[1], (hidden,)),
        "wk": n(ks[2], (hidden, hidden)), "bk": n(ks[3], (hidden,)),
        "wv": n(ks[4], (hidden, hidden)), "bv": n(ks[5], (hidden,)),
        "wo": n(ks[6], (hidden, hidden)), "bo": n(ks[7], (hidden,)),
        "ln_attn_g": 1.0 + n(ks[8], (hidden,)), "ln_attn_b": n(ks[9], (hidden,)),
        "w1": n(ks[10], (hidden, intermediate)), "b1": n(ks[11], (intermediate,)),
        "w2": n(ks[12], (intermediate, hidden)), "b2": n(ks[13], (hidden,)),
        "ln_out_g": jnp.ones((hidden,), f32), "ln_out_b": jnp.zeros((hidden,), f32),
    }


def pack_params(raw, hidden, num_heads):
    """Convert full (in, out) f32 weights into the kernel layout (per-head, bf16)."""
    dh = hidden // num_heads
    bf16 = jnp.bfloat16

    def heads_out(w):   # (H, H) -> (nh, H, dh): output dim split per head
        return jnp.transpose(w.reshape(hidden, num_heads, dh), (1, 0, 2)).astype(bf16)

    def heads_bias(b):  # (H,) -> (nh, 1, dh)
        return b.reshape(num_heads, 1, dh)

    def row(b):         # (X,) -> (1, X)
        return b.reshape(1, -1)

    return {
        "num_heads": num_heads,
        "wq": heads_out(raw["wq"]), "bq": heads_bias(raw["bq"]),
        "wk": heads_out(raw["wk"]), "bk": heads_bias(raw["bk"]),
        "wv": heads_out(raw["wv"]), "bv": heads_bias(raw["bv"]),
        "wo": raw["wo"].reshape(num_heads, dh, hidden).astype(bf16),   # input dim per head
        "bo": row(raw["bo"]),
        "ln_attn_g": row(raw["ln_attn_g"]), "ln_attn_b": row(raw["ln_attn_b"]),
        "w1": raw["w1"].astype(bf16), "b1": row(raw["b1"]),
        "w2": raw["w2"].astype(bf16), "b2": row(raw["b2"]),
        "ln_out_g": row(raw["ln_out_g"]), "ln_out_b": row(raw["ln_out_b"]),
    }


# ------------------------------ pure-JAX reference -----------------------------

def _ref_layernorm(y, g, b):
    mu = jnp.mean(y, axis=-1, keepdims=True)
    var = jnp.mean((y - mu) ** 2, axis=-1, keepdims=True)
    return (y - mu) / jnp.sqrt(var + LN_EPS) * g + b


def reference_layer(raw, x, mask, drop_attn=False, drop_mlp=False):
    nh = raw["num_heads"]
    B, S, H = x.shape
    dh = H // nh
    out = x
    if not drop_attn:
        q = out @ raw["wq"] + raw["bq"]
        k = out @ raw["wk"] + raw["bk"]
        v = out @ raw["wv"] + raw["bv"]
        split = lambda t: jnp.transpose(t.reshape(B, S, nh, dh), (0, 2, 1, 3))
        qh, kh, vh = split(q), split(k), split(v)
        scores = jnp.einsum("bhqd,bhkd->bhqk", qh, kh) / math.sqrt(dh)
        m2d = (mask[:, None, :, None] * mask[:, None, None, :]) > 0     # (B,1,S,S)
        scores = jnp.where(m2d, scores, -MASK_NEG)
        probs = jax.nn.softmax(scores, axis=-1)
        probs = jnp.where(m2d, probs, 0.0)                              # XSoftmax zeroing
        ctx = jnp.einsum("bhqk,bhkd->bhqd", probs, vh)
        ctx = jnp.transpose(ctx, (0, 2, 1, 3)).reshape(B, S, H)
        attn = ctx @ raw["wo"] + raw["bo"]
        out = _ref_layernorm(attn + out, raw["ln_attn_g"], raw["ln_attn_b"])
    if not drop_mlp:
        h = out @ raw["w1"] + raw["b1"]
        h = 0.5 * h * (1.0 + jax.scipy.special.erf(h / math.sqrt(2.0)))
        y = h @ raw["w2"] + raw["b2"]
        out = _ref_layernorm(y + out, raw["ln_out_g"], raw["ln_out_b"])
    return out


# ----------------------------------- main --------------------------------------

if __name__ == "__main__":
    B, S, H = 2, 8, 32
    NUM_HEADS, INTERMEDIATE = 4, 64

    root = jax.random.PRNGKey(0)
    k_x, k_p = jax.random.split(root)

    hidden_states = jax.random.normal(k_x, (B, S, H), jnp.float32)
    attention_mask = jnp.ones((B, S), jnp.float32).at[1, 6:].set(0.0)   # pad tail of batch 1

    raw = init_raw_params(k_p, H, INTERMEDIATE, NUM_HEADS)
    params = pack_params(raw, H, NUM_HEADS)

    variants = {"full": (False, False),      # attention kept, MLP kept
                "no_attn": (True, False),    # drop_attn_list[layer] = True
                "no_mlp": (False, True)}     # drop_mlp_list[layer]  = True

    for name, (da, dm) in variants.items():
        out = deberta_v2_dropped_layer(params, hidden_states, attention_mask,
                                       drop_attn=da, drop_mlp=dm)
        out = jax.block_until_ready(out)
        assert out.shape == (B, S, H)
        assert bool(jnp.all(jnp.isfinite(out)))
        ref = reference_layer(raw, hidden_states, attention_mask, da, dm)
        err = float(jnp.max(jnp.abs(out - ref)))
        assert err < 5e-2, f"{name}: max abs err {err}"

    print("KERNEL_OK")
</pallas_src>

<mosaic_0001>
module attributes {stable_mosaic.version = 11 : i64} {
  func.func @attention_kernel(%arg0: i32, %arg1: i32, %arg2: memref<1x8x32xf32, #tpu.memory_space<vmem>>, %arg3: memref<1x8x32xf32, #tpu.memory_space<vmem>>, %arg4: memref<1x8x1xf32, #tpu.memory_space<vmem>>, %arg5: memref<1x1x8xf32, #tpu.memory_space<vmem>>, %arg6: memref<4x32x8xbf16, #tpu.memory_space<vmem>>, %arg7: memref<4x1x8xf32, #tpu.memory_space<vmem>>, %arg8: memref<4x32x8xbf16, #tpu.memory_space<vmem>>, %arg9: memref<4x1x8xf32, #tpu.memory_space<vmem>>, %arg10: memref<4x32x8xbf16, #tpu.memory_space<vmem>>, %arg11: memref<4x1x8xf32, #tpu.memory_space<vmem>>, %arg12: memref<4x8x32xbf16, #tpu.memory_space<vmem>>, %arg13: memref<1x32xf32, #tpu.memory_space<vmem>>, %arg14: memref<1x32xf32, #tpu.memory_space<vmem>>, %arg15: memref<1x32xf32, #tpu.memory_space<vmem>>, %arg16: memref<1x8x32xf32, #tpu.memory_space<vmem>>, %arg17: memref<4x8x8xbf16, #tpu.memory_space<vmem>>, %arg18: memref<4x8x8xbf16, #tpu.memory_space<vmem>>) attributes {dimension_semantics = [#tpu.dimension_semantics<parallel>, #tpu.dimension_semantics<arbitrary>], iteration_bounds = array<i64: 2, 1>, scalar_prefetch = 0 : i64, scratch_operands = 2 : i64, tpu.core_type = #tpu.core_type<tc>, window_params = [{transform_indices = @transform_0, window_bounds = array<i64: 1, 8, 32>}, {transform_indices = @transform_1, window_bounds = array<i64: 1, 8, 32>}, {transform_indices = @transform_2, window_bounds = array<i64: 1, 8, 1>}, {transform_indices = @transform_3, window_bounds = array<i64: 1, 1, 8>}, {pipeline_mode = #tpu.pipeline_mode<synchronous>, transform_indices = @transform_4, window_bounds = array<i64: 4, 32, 8>}, {pipeline_mode = #tpu.pipeline_mode<synchronous>, transform_indices = @transform_5, window_bounds = array<i64: 4, 1, 8>}, {pipeline_mode = #tpu.pipeline_mode<synchronous>, transform_indices = @transform_6, window_bounds = array<i64: 4, 32, 8>}, {pipeline_mode = #tpu.pipeline_mode<synchronous>, transform_indices = @transform_7, window_bounds = array<i64: 4, 1, 8>}, {pipeline_mode = #tpu.pipeline_mode<synchronous>, transform_indices = @transform_8, window_bounds = array<i64: 4, 32, 8>}, {pipeline_mode = #tpu.pipeline_mode<synchronous>, transform_indices = @transform_9, window_bounds = array<i64: 4, 1, 8>}, {pipeline_mode = #tpu.pipeline_mode<synchronous>, transform_indices = @transform_10, window_bounds = array<i64: 4, 8, 32>}, {pipeline_mode = #tpu.pipeline_mode<synchronous>, transform_indices = @transform_11, window_bounds = array<i64: 1, 32>}, {pipeline_mode = #tpu.pipeline_mode<synchronous>, transform_indices = @transform_12, window_bounds = array<i64: 1, 32>}, {pipeline_mode = #tpu.pipeline_mode<synchronous>, transform_indices = @transform_13, window_bounds = array<i64: 1, 32>}, {transform_indices = @transform_14, window_bounds = array<i64: 1, 8, 32>}]} {
    %c0_i32 = arith.constant 0 : i32
    %0 = arith.cmpi eq, %arg1, %c0_i32 : i32
    %1 = arith.extui %0 : i1 to i32
    %c0_i32_0 = arith.constant 0 : i32
    %2 = arith.cmpi ne, %1, %c0_i32_0 : i32
    scf.if %2 {
      %c0_109 = arith.constant 0 : index
      %c0_110 = arith.constant 0 : index
      %c0_111 = arith.constant 0 : index
      %187 = vector.load %arg3[%c0_109, %c0_110, %c0_111] : memref<1x8x32xf32, #tpu.memory_space<vmem>>, vector<1x8x32xf32>
      %188 = vector.shape_cast %187 : vector<1x8x32xf32> to vector<8x32xf32>
      %189 = arith.truncf %188 : vector<8x32xf32> to vector<8x32xbf16>
      %c0_112 = arith.constant 0 : index
      %c0_113 = arith.constant 0 : index
      %c0_114 = arith.constant 0 : index
      %190 = vector.load %arg8[%c0_112, %c0_113, %c0_114] : memref<4x32x8xbf16, #tpu.memory_space<vmem>>, vector<1x32x8xbf16>
      %191 = vector.shape_cast %190 : vector<1x32x8xbf16> to vector<32x8xbf16>
      %cst_115 = arith.constant dense<0.000000e+00> : vector<8x8xf32>
      %192 = tpu.matmul %189, %191, %cst_115 {dimension_numbers = #tpu.dot_dimension_numbers<[1], [0], [0], [1], [0, 0, 1, 1], [], []>} : vector<8x32xbf16>, vector<32x8xbf16>, vector<8x8xf32> -> vector<8x8xf32>
      %c0_116 = arith.constant 0 : index
      %c0_117 = arith.constant 0 : index
      %c0_118 = arith.constant 0 : index
      %193 = vector.load %arg9[%c0_116, %c0_117, %c0_118] : memref<4x1x8xf32, #tpu.memory_space<vmem>>, vector<1x1x8xf32>
      %194 = vector.shape_cast %193 : vector<1x1x8xf32> to vector<1x8xf32>
      %195 = vector.broadcast %194 : vector<1x8xf32> to vector<8x8xf32>
      %196 = arith.addf %192, %195 : vector<8x8xf32>
      %c0_119 = arith.constant 0 : index
      %c0_120 = arith.constant 0 : index
      %c0_121 = arith.constant 0 : index
      %197 = vector.load %arg10[%c0_119, %c0_120, %c0_121] : memref<4x32x8xbf16, #tpu.memory_space<vmem>>, vector<1x32x8xbf16>
      %198 = vector.shape_cast %197 : vector<1x32x8xbf16> to vector<32x8xbf16>
      %cst_122 = arith.constant dense<0.000000e+00> : vector<8x8xf32>
      %199 = tpu.matmul %189, %198, %cst_122 {dimension_numbers = #tpu.dot_dimension_numbers<[1], [0], [0], [1], [0, 0, 1, 1], [], []>} : vector<8x32xbf16>, vector<32x8xbf16>, vector<8x8xf32> -> vector<8x8xf32>
      %c0_123 = arith.constant 0 : index
      %c0_124 = arith.constant 0 : index
      %c0_125 = arith.constant 0 : index
      %200 = vector.load %arg11[%c0_123, %c0_124, %c0_125] : memref<4x1x8xf32, #tpu.memory_space<vmem>>, vector<1x1x8xf32>
      %201 = vector.shape_cast %200 : vector<1x1x8xf32> to vector<1x8xf32>
      %202 = vector.broadcast %201 : vector<1x8xf32> to vector<8x8xf32>
      %203 = arith.addf %199, %202 : vector<8x8xf32>
      %204 = arith.truncf %196 : vector<8x8xf32> to vector<8x8xbf16>
      %c0_126 = arith.constant 0 : index
      %c0_127 = arith.constant 0 : index
      %c0_128 = arith.constant 0 : index
      %205 = vector.load %arg17[%c0_126, %c0_127, %c0_128] : memref<4x8x8xbf16, #tpu.memory_space<vmem>>, vector<1x8x8xbf16>
      %206 = vector.shape_cast %205 : vector<1x8x8xbf16> to vector<8x8xbf16>
      %207 = vector.shape_cast %204 : vector<8x8xbf16> to vector<1x8x8xbf16>
      tpu.vector_store %arg17[%c0_126, %c0_127, %c0_128], %207 {strides = array<i32>} : memref<4x8x8xbf16, #tpu.memory_space<vmem>>, vector<1x8x8xbf16>,
      %208 = arith.truncf %203 : vector<8x8xf32> to vector<8x8xbf16>
      %c0_129 = arith.constant 0 : index
      %c0_130 = arith.constant 0 : index
      %c0_131 = arith.constant 0 : index
      %209 = vector.load %arg18[%c0_129, %c0_130, %c0_131] : memref<4x8x8xbf16, #tpu.memory_space<vmem>>, vector<1x8x8xbf16>
      %210 = vector.shape_cast %209 : vector<1x8x8xbf16> to vector<8x8xbf16>
      %211 = vector.shape_cast %208 : vector<8x8xbf16> to vector<1x8x8xbf16>
      tpu.vector_store %arg18[%c0_129, %c0_130, %c0_131], %211 {strides = array<i32>} : memref<4x8x8xbf16, #tpu.memory_space<vmem>>, vector<1x8x8xbf16>,
      %c1_132 = arith.constant 1 : index
      %c0_133 = arith.constant 0 : index
      %c0_134 = arith.constant 0 : index
      %212 = vector.load %arg8[%c1_132, %c0_133, %c0_134] : memref<4x32x8xbf16, #tpu.memory_space<vmem>>, vector<1x32x8xbf16>
      %213 = vector.shape_cast %212 : vector<1x32x8xbf16> to vector<32x8xbf16>
      %cst_135 = arith.constant dense<0.000000e+00> : vector<8x8xf32>
      %214 = tpu.matmul %189, %213, %cst_135 {dimension_numbers = #tpu.dot_dimension_numbers<[1], [0], [0], [1], [0, 0, 1, 1], [], []>} : vector<8x32xbf16>, vector<32x8xbf16>, vector<8x8xf32> -> vector<8x8xf32>
      %c1_136 = arith.constant 1 : index
      %c0_137 = arith.constant 0 : index
      %c0_138 = arith.constant 0 : index
      %215 = vector.load %arg9[%c1_136, %c0_137, %c0_138] : memref<4x1x8xf32, #tpu.memory_space<vmem>>, vector<1x1x8xf32>
      %216 = vector.shape_cast %215 : vector<1x1x8xf32> to vector<1x8xf32>
      %217 = vector.broadcast %216 : vector<1x8xf32> to vector<8x8xf32>
      %218 = arith.addf %214, %217 : vector<8x8xf32>
      %c1_139 = arith.constant 1 : index
      %c0_140 = arith.constant 0 : index
      %c0_141 = arith.constant 0 : index
      %219 = vector.load %arg10[%c1_139, %c0_140, %c0_141] : memref<4x32x8xbf16, #tpu.memory_space<vmem>>, vector<1x32x8xbf16>
      %220 = vector.shape_cast %219 : vector<1x32x8xbf16> to vector<32x8xbf16>
      %cst_142 = arith.constant dense<0.000000e+00> : vector<8x8xf32>
      %221 = tpu.matmul %189, %220, %cst_142 {dimension_numbers = #tpu.dot_dimension_numbers<[1], [0], [0], [1], [0, 0, 1, 1], [], []>} : vector<8x32xbf16>, vector<32x8xbf16>, vector<8x8xf32> -> vector<8x8xf32>
      %c1_143 = arith.constant 1 : index
      %c0_144 = arith.constant 0 : index
      %c0_145 = arith.constant 0 : index
      %222 = vector.load %arg11[%c1_143, %c0_144, %c0_145] : memref<4x1x8xf32, #tpu.memory_space<vmem>>, vector<1x1x8xf32>
      %223 = vector.shape_cast %222 : vector<1x1x8xf32> to vector<1x8xf32>
      %224 = vector.broadcast %223 : vector<1x8xf32> to vector<8x8xf32>
      %225 = arith.addf %221, %224 : vector<8x8xf32>
      %226 = arith.truncf %218 : vector<8x8xf32> to vector<8x8xbf16>
      %c1_146 = arith.constant 1 : index
      %c0_147 = arith.constant 0 : index
      %c0_148 = arith.constant 0 : index
      %227 = vector.load %arg17[%c1_146, %c0_147, %c0_148] : memref<4x8x8xbf16, #tpu.memory_space<vmem>>, vector<1x8x8xbf16>
      %228 = vector.shape_cast %227 : vector<1x8x8xbf16> to vector<8x8xbf16>
      %229 = vector.shape_cast %226 : vector<8x8xbf16> to vector<1x8x8xbf16>
      tpu.vector_store %arg17[%c1_146, %c0_147, %c0_148], %229 {strides = array<i32>} : memref<4x8x8xbf16, #tpu.memory_space<vmem>>, vector<1x8x8xbf16>,
      %230 = arith.truncf %225 : vector<8x8xf32> to vector<8x8xbf16>
      %c1_149 = arith.constant 1 : index
      %c0_150 = arith.constant 0 : index
      %c0_151 = arith.constant 0 : index
      %231 = vector.load %arg18[%c1_149, %c0_150, %c0_151] : memref<4x8x8xbf16, #tpu.memory_space<vmem>>, vector<1x8x8xbf16>
      %232 = vector.shape_cast %231 : vector<1x8x8xbf16> to vector<8x8xbf16>
      %233 = vector.shape_cast %230 : vector<8x8xbf16> to vector<1x8x8xbf16>
      tpu.vector_store %arg18[%c1_149, %c0_150, %c0_151], %233 {strides = array<i32>} : memref<4x8x8xbf16, #tpu.memory_space<vmem>>, vector<1x8x8xbf16>,
      %c2_152 = arith.constant 2 : index
      %c0_153 = arith.constant 0 : index
      %c0_154 = arith.constant 0 : index
      %234 = vector.load %arg8[%c2_152, %c0_153, %c0_154] : memref<4x32x8xbf16, #tpu.memory_space<vmem>>, vector<1x32x8xbf16>
      %235 = vector.shape_cast %234 : vector<1x32x8xbf16> to vector<32x8xbf16>
      %cst_155 = arith.constant dense<0.000000e+00> : vector<8x8xf32>
      %236 = tpu.matmul %189, %235, %cst_155 {dimension_numbers = #tpu.dot_dimension_numbers<[1], [0], [0], [1], [0, 0, 1, 1], [], []>} : vector<8x32xbf16>, vector<32x8xbf16>, vector<8x8xf32> -> vector<8x8xf32>
      %c2_156 = arith.constant 2 : index
      %c0_157 = arith.constant 0 : index
      %c0_158 = arith.constant 0 : index
      %237 = vector.load %arg9[%c2_156, %c0_157, %c0_158] : memref<4x1x8xf32, #tpu.memory_space<vmem>>, vector<1x1x8xf32>
      %238 = vector.shape_cast %237 : vector<1x1x8xf32> to vector<1x8xf32>
      %239 = vector.broadcast %238 : vector<1x8xf32> to vector<8x8xf32>
      %240 = arith.addf %236, %239 : vector<8x8xf32>
      %c2_159 = arith.constant 2 : index
      %c0_160 = arith.constant 0 : index
      %c0_161 = arith.constant 0 : index
      %241 = vector.load %arg10[%c2_159, %c0_160, %c0_161] : memref<4x32x8xbf16, #tpu.memory_space<vmem>>, vector<1x32x8xbf16>
      %242 = vector.shape_cast %241 : vector<1x32x8xbf16> to vector<32x8xbf16>
      %cst_162 = arith.constant dense<0.000000e+00> : vector<8x8xf32>
      %243 = tpu.matmul %189, %242, %cst_162 {dimension_numbers = #tpu.dot_dimension_numbers<[1], [0], [0], [1], [0, 0, 1, 1], [], []>} : vector<8x32xbf16>, vector<32x8xbf16>, vector<8x8xf32> -> vector<8x8xf32>
      %c2_163 = arith.constant 2 : index
      %c0_164 = arith.constant 0 : index
      %c0_165 = arith.constant 0 : index
      %244 = vector.load %arg11[%c2_163, %c0_164, %c0_165] : memref<4x1x8xf32, #tpu.memory_space<vmem>>, vector<1x1x8xf32>
      %245 = vector.shape_cast %244 : vector<1x1x8xf32> to vector<1x8xf32>
      %246 = vector.broadcast %245 : vector<1x8xf32> to vector<8x8xf32>
      %247 = arith.addf %243, %246 : vector<8x8xf32>
      %248 = arith.truncf %240 : vector<8x8xf32> to vector<8x8xbf16>
      %c2_166 = arith.constant 2 : index
      %c0_167 = arith.constant 0 : index
      %c0_168 = arith.constant 0 : index
      %249 = vector.load %arg17[%c2_166, %c0_167, %c0_168] : memref<4x8x8xbf16, #tpu.memory_space<vmem>>, vector<1x8x8xbf16>
      %250 = vector.shape_cast %249 : vector<1x8x8xbf16> to vector<8x8xbf16>
      %251 = vector.shape_cast %248 : vector<8x8xbf16> to vector<1x8x8xbf16>
      tpu.vector_store %arg17[%c2_166, %c0_167, %c0_168], %251 {strides = array<i32>} : memref<4x8x8xbf16, #tpu.memory_space<vmem>>, vector<1x8x8xbf16>,
      %252 = arith.truncf %247 : vector<8x8xf32> to vector<8x8xbf16>
      %c2_169 = arith.constant 2 : index
      %c0_170 = arith.constant 0 : index
      %c0_171 = arith.constant 0 : index
      %253 = vector.load %arg18[%c2_169, %c0_170, %c0_171] : memref<4x8x8xbf16, #tpu.memory_space<vmem>>, vector<1x8x8xbf16>
      %254 = vector.shape_cast %253 : vector<1x8x8xbf16> to vector<8x8xbf16>
      %255 = vector.shape_cast %252 : vector<8x8xbf16> to vector<1x8x8xbf16>
      tpu.vector_store %arg18[%c2_169, %c0_170, %c0_171], %255 {strides = array<i32>} : memref<4x8x8xbf16, #tpu.memory_space<vmem>>, vector<1x8x8xbf16>,
      %c3_172 = arith.constant 3 : index
      %c0_173 = arith.constant 0 : index
      %c0_174 = arith.constant 0 : index
      %256 = vector.load %arg8[%c3_172, %c0_173, %c0_174] : memref<4x32x8xbf16, #tpu.memory_space<vmem>>, vector<1x32x8xbf16>
      %257 = vector.shape_cast %256 : vector<1x32x8xbf16> to vector<32x8xbf16>
      %cst_175 = arith.constant dense<0.000000e+00> : vector<8x8xf32>
      %258 = tpu.matmul %189, %257, %cst_175 {dimension_numbers = #tpu.dot_dimension_numbers<[1], [0], [0], [1], [0, 0, 1, 1], [], []>} : vector<8x32xbf16>, vector<32x8xbf16>, vector<8x8xf32> -> vector<8x8xf32>
      %c3_176 = arith.constant 3 : index
      %c0_177 = arith.constant 0 : index
      %c0_178 = arith.constant 0 : index
      %259 = vector.load %arg9[%c3_176, %c0_177, %c0_178] : memref<4x1x8xf32, #tpu.memory_space<vmem>>, vector<1x1x8xf32>
      %260 = vector.shape_cast %259 : vector<1x1x8xf32> to vector<1x8xf32>
      %261 = vector.broadcast %260 : vector<1x8xf32> to vector<8x8xf32>
      %262 = arith.addf %258, %261 : vector<8x8xf32>
      %c3_179 = arith.constant 3 : index
      %c0_180 = arith.constant 0 : index
      %c0_181 = arith.constant 0 : index
      %263 = vector.load %arg10[%c3_179, %c0_180, %c0_181] : memref<4x32x8xbf16, #tpu.memory_space<vmem>>, vector<1x32x8xbf16>
      %264 = vector.shape_cast %263 : vector<1x32x8xbf16> to vector<32x8xbf16>
      %cst_182 = arith.constant dense<0.000000e+00> : vector<8x8xf32>
      %265 = tpu.matmul %189, %264, %cst_182 {dimension_numbers = #tpu.dot_dimension_numbers<[1], [0], [0], [1], [0, 0, 1, 1], [], []>} : vector<8x32xbf16>, vector<32x8xbf16>, vector<8x8xf32> -> vector<8x8xf32>
      %c3_183 = arith.constant 3 : index
      %c0_184 = arith.constant 0 : index
      %c0_185 = arith.constant 0 : index
      %266 = vector.load %arg11[%c3_183, %c0_184, %c0_185] : memref<4x1x8xf32, #tpu.memory_space<vmem>>, vector<1x1x8xf32>
      %267 = vector.shape_cast %266 : vector<1x1x8xf32> to vector<1x8xf32>
      %268 = vector.broadcast %267 : vector<1x8xf32> to vector<8x8xf32>
      %269 = arith.addf %265, %268 : vector<8x8xf32>
      %270 = arith.truncf %262 : vector<8x8xf32> to vector<8x8xbf16>
      %c3_186 = arith.constant 3 : index
      %c0_187 = arith.constant 0 : index
      %c0_188 = arith.constant 0 : index
      %271 = vector.load %arg17[%c3_186, %c0_187, %c0_188] : memref<4x8x8xbf16, #tpu.memory_space<vmem>>, vector<1x8x8xbf16>
      %272 = vector.shape_cast %271 : vector<1x8x8xbf16> to vector<8x8xbf16>
      %273 = vector.shape_cast %270 : vector<8x8xbf16> to vector<1x8x8xbf16>
      tpu.vector_store %arg17[%c3_186, %c0_187, %c0_188], %273 {strides = array<i32>} : memref<4x8x8xbf16, #tpu.memory_space<vmem>>, vector<1x8x8xbf16>,
      %274 = arith.truncf %269 : vector<8x8xf32> to vector<8x8xbf16>
      %c3_189 = arith.constant 3 : index
      %c0_190 = arith.constant 0 : index
      %c0_191 = arith.constant 0 : index
      %275 = vector.load %arg18[%c3_189, %c0_190, %c0_191] : memref<4x8x8xbf16, #tpu.memory_space<vmem>>, vector<1x8x8xbf16>
      %276 = vector.shape_cast %275 : vector<1x8x8xbf16> to vector<8x8xbf16>
      %277 = vector.shape_cast %274 : vector<8x8xbf16> to vector<1x8x8xbf16>
      tpu.vector_store %arg18[%c3_189, %c0_190, %c0_191], %277 {strides = array<i32>} : memref<4x8x8xbf16, #tpu.memory_space<vmem>>, vector<1x8x8xbf16>,
    } else {
    }
    %c0 = arith.constant 0 : index
    %c0_1 = arith.constant 0 : index
    %c0_2 = arith.constant 0 : index
    %3 = vector.load %arg2[%c0, %c0_1, %c0_2] : memref<1x8x32xf32, #tpu.memory_space<vmem>>, vector<1x8x32xf32>
    %4 = vector.shape_cast %3 : vector<1x8x32xf32> to vector<8x32xf32>
    %5 = arith.truncf %4 : vector<8x32xf32> to vector<8x32xbf16>
    %c0_3 = arith.constant 0 : index
    %c0_4 = arith.constant 0 : index
    %c0_5 = arith.constant 0 : index
    %6 = vector.load %arg4[%c0_3, %c0_4, %c0_5] : memref<1x8x1xf32, #tpu.memory_space<vmem>>, vector<1x8x1xf32>
    %7 = vector.shape_cast %6 : vector<1x8x1xf32> to vector<8x1xf32>
    %c0_6 = arith.constant 0 : index
    %c0_7 = arith.constant 0 : index
    %c0_8 = arith.constant 0 : index
    %8 = vector.load %arg5[%c0_6, %c0_7, %c0_8] : memref<1x1x8xf32, #tpu.memory_space<vmem>>, vector<1x1x8xf32>
    %9 = vector.shape_cast %8 : vector<1x1x8xf32> to vector<1x8xf32>
    %10 = vector.broadcast %7 : vector<8x1xf32> to vector<8x8xf32>
    %11 = vector.broadcast %9 : vector<1x8xf32> to vector<8x8xf32>
    %12 = arith.mulf %10, %11 : vector<8x8xf32>
    %cst = arith.constant 1.000000e+00 : f32
    %13 = vector.broadcast %cst : f32 to vector<8x8xf32>
    %14 = arith.subf %12, %13 : vector<8x8xf32>
    %cst_9 = arith.constant 1.000000e+30 : f32
    %15 = vector.broadcast %cst_9 : f32 to vector<8x8xf32>
    %16 = arith.mulf %14, %15 : vector<8x8xf32>
    %c0_10 = arith.constant 0 : index
    %c0_11 = arith.constant 0 : index
    %17 = vector.load %arg13[%c0_10, %c0_11] : memref<1x32xf32, #tpu.memory_space<vmem>>, vector<1x32xf32>
    %18 = vector.broadcast %17 : vector<1x32xf32> to vector<8x32xf32>
    %19 = arith.addf %4, %18 : vector<8x32xf32>
    %c0_12 = arith.constant 0 : index
    %c0_13 = arith.constant 0 : index
    %c0_14 = arith.constant 0 : index
    %20 = vector.load %arg6[%c0_12, %c0_13, %c0_14] : memref<4x32x8xbf16, #tpu.memory_space<vmem>>, vector<1x32x8xbf16>
    %21 = vector.shape_cast %20 : vector<1x32x8xbf16> to vector<32x8xbf16>
    %cst_15 = arith.constant dense<0.000000e+00> : vector<8x8xf32>
    %22 = tpu.matmul %5, %21, %cst_15 {dimension_numbers = #tpu.dot_dimension_numbers<[1], [0], [0], [1], [0, 0, 1, 1], [], []>} : vector<8x32xbf16>, vector<32x8xbf16>, vector<8x8xf32> -> vector<8x8xf32>
    %c0_16 = arith.constant 0 : index
    %c0_17 = arith.constant 0 : index
    %c0_18 = arith.constant 0 : index
    %23 = vector.load %arg7[%c0_16, %c0_17, %c0_18] : memref<4x1x8xf32, #tpu.memory_space<vmem>>, vector<1x1x8xf32>
    %24 = vector.shape_cast %23 : vector<1x1x8xf32> to vector<1x8xf32>
    %25 = vector.broadcast %24 : vector<1x8xf32> to vector<8x8xf32>
    %26 = arith.addf %22, %25 : vector<8x8xf32>
    %cst_19 = arith.constant 0.353553385 : f32
    %27 = vector.broadcast %cst_19 : f32 to vector<8x8xf32>
    %28 = arith.mulf %26, %27 : vector<8x8xf32>
    %29 = arith.truncf %28 : vector<8x8xf32> to vector<8x8xbf16>
    %c0_20 = arith.constant 0 : index
    %c0_21 = arith.constant 0 : index
    %c0_22 = arith.constant 0 : index
    %30 = vector.load %arg17[%c0_20, %c0_21, %c0_22] : memref<4x8x8xbf16, #tpu.memory_space<vmem>>, vector<1x8x8xbf16>
    %31 = vector.shape_cast %30 : vector<1x8x8xbf16> to vector<8x8xbf16>
    %cst_23 = arith.constant dense<0.000000e+00> : vector<8x8xf32>
    %32 = tpu.matmul %29, %31, %cst_23 {dimension_numbers = #tpu.dot_dimension_numbers<[1], [1], [0], [0], [0, 0, 1, 0], [], []>} : vector<8x8xbf16>, vector<8x8xbf16>, vector<8x8xf32> -> vector<8x8xf32>
    %33 = arith.addf %32, %16 : vector<8x8xf32>
    %cst_24 = arith.constant dense<0xFF800000> : vector<8xf32>
    %34 = vector.multi_reduction <maximumf>, %33, %cst_24 [1] : vector<8x8xf32> to vector<8xf32>
    %35 = vector.shape_cast %34 : vector<8xf32> to vector<8x1xf32>
    %36 = vector.broadcast %35 : vector<8x1xf32> to vector<8x8xf32>
    %37 = arith.subf %33, %36 : vector<8x8xf32>
    %38 = math.exp %37 : vector<8x8xf32>
    %cst_25 = arith.constant dense<0.000000e+00> : vector<8xf32>
    %39 = vector.multi_reduction <add>, %38, %cst_25 [1] : vector<8x8xf32> to vector<8xf32>
    %40 = vector.shape_cast %39 : vector<8xf32> to vector<8x1xf32>
    %41 = tpu.reciprocal %40 {approx = true} : vector<8x1xf32> -> vector<8x1xf32>
    %42 = vector.broadcast %41 : vector<8x1xf32> to vector<8x8xf32>
    %43 = arith.mulf %38, %42 : vector<8x8xf32>
    %44 = arith.truncf %43 : vector<8x8xf32> to vector<8x8xbf16>
    %c0_26 = arith.constant 0 : index
    %c0_27 = arith.constant 0 : index
    %c0_28 = arith.constant 0 : index
    %45 = vector.load %arg18[%c0_26, %c0_27, %c0_28] : memref<4x8x8xbf16, #tpu.memory_space<vmem>>, vector<1x8x8xbf16>
    %46 = vector.shape_cast %45 : vector<1x8x8xbf16> to vector<8x8xbf16>
    %cst_29 = arith.constant dense<0.000000e+00> : vector<8x8xf32>
    %47 = tpu.matmul %44, %46, %cst_29 {dimension_numbers = #tpu.dot_dimension_numbers<[1], [0], [0], [1], [0, 0, 1, 1], [], []>} : vector<8x8xbf16>, vector<8x8xbf16>, vector<8x8xf32> -> vector<8x8xf32>
    %48 = vector.broadcast %7 : vector<8x1xf32> to vector<8x8xf32>
    %49 = arith.mulf %47, %48 : vector<8x8xf32>
    %50 = arith.truncf %49 : vector<8x8xf32> to vector<8x8xbf16>
    %c0_30 = arith.constant 0 : index
    %c0_31 = arith.constant 0 : index
    %c0_32 = arith.constant 0 : index
    %51 = vector.load %arg12[%c0_30, %c0_31, %c0_32] : memref<4x8x32xbf16, #tpu.memory_space<vmem>>, vector<1x8x32xbf16>
    %52 = vector.shape_cast %51 : vector<1x8x32xbf16> to vector<8x32xbf16>
    %cst_33 = arith.constant dense<0.000000e+00> : vector<8x32xf32>
    %53 = tpu.matmul %50, %52, %cst_33 {dimension_numbers = #tpu.dot_dimension_numbers<[1], [0], [0], [1], [0, 0, 1, 1], [], []>} : vector<8x8xbf16>, vector<8x32xbf16>, vector<8x32xf32> -> vector<8x32xf32>
    %54 = arith.addf %19, %53 : vector<8x32xf32>
    %c1 = arith.constant 1 : index
    %c0_34 = arith.constant 0 : index
    %c0_35 = arith.constant 0 : index
    %55 = vector.load %arg6[%c1, %c0_34, %c0_35] : memref<4x32x8xbf16, #tpu.memory_space<vmem>>, vector<1x32x8xbf16>
    %56 = vector.shape_cast %55 : vector<1x32x8xbf16> to vector<32x8xbf16>
    %cst_36 = arith.constant dense<0.000000e+00> : vector<8x8xf32>
    %57 = tpu.matmul %5, %56, %cst_36 {dimension_numbers = #tpu.dot_dimension_numbers<[1], [0], [0], [1], [0, 0, 1, 1], [], []>} : vector<8x32xbf16>, vector<32x8xbf16>, vector<8x8xf32> -> vector<8x8xf32>
    %c1_37 = arith.constant 1 : index
    %c0_38 = arith.constant 0 : index
    %c0_39 = arith.constant 0 : index
    %58 = vector.load %arg7[%c1_37, %c0_38, %c0_39] : memref<4x1x8xf32, #tpu.memory_space<vmem>>, vector<1x1x8xf32>
    %59 = vector.shape_cast %58 : vector<1x1x8xf32> to vector<1x8xf32>
    %60 = vector.broadcast %59 : vector<1x8xf32> to vector<8x8xf32>
    %61 = arith.addf %57, %60 : vector<8x8xf32>
    %cst_40 = arith.constant 0.353553385 : f32
    %62 = vector.broadcast %cst_40 : f32 to vector<8x8xf32>
    %63 = arith.mulf %61, %62 : vector<8x8xf32>
    %64 = arith.truncf %63 : vector<8x8xf32> to vector<8x8xbf16>
    %c1_41 = arith.constant 1 : index
    %c0_42 = arith.constant 0 : index
    %c0_43 = arith.constant 0 : index
    %65 = vector.load %arg17[%c1_41, %c0_42, %c0_43] : memref<4x8x8xbf16, #tpu.memory_space<vmem>>, vector<1x8x8xbf16>
    %66 = vector.shape_cast %65 : vector<1x8x8xbf16> to vector<8x8xbf16>
    %cst_44 = arith.constant dense<0.000000e+00> : vector<8x8xf32>
    %67 = tpu.matmul %64, %66, %cst_44 {dimension_numbers = #tpu.dot_dimension_numbers<[1], [1], [0], [0], [0, 0, 1, 0], [], []>} : vector<8x8xbf16>, vector<8x8xbf16>, vector<8x8xf32> -> vector<8x8xf32>
    %68 = arith.addf %67, %16 : vector<8x8xf32>
    %cst_45 = arith.constant dense<0xFF800000> : vector<8xf32>
    %69 = vector.multi_reduction <maximumf>, %68, %cst_45 [1] : vector<8x8xf32> to vector<8xf32>
    %70 = vector.shape_cast %69 : vector<8xf32> to vector<8x1xf32>
    %71 = vector.broadcast %70 : vector<8x1xf32> to vector<8x8xf32>
    %72 = arith.subf %68, %71 : vector<8x8xf32>
    %73 = math.exp %72 : vector<8x8xf32>
    %cst_46 = arith.constant dense<0.000000e+00> : vector<8xf32>
    %74 = vector.multi_reduction <add>, %73, %cst_46 [1] : vector<8x8xf32> to vector<8xf32>
    %75 = vector.shape_cast %74 : vector<8xf32> to vector<8x1xf32>
    %76 = tpu.reciprocal %75 {approx = true} : vector<8x1xf32> -> vector<8x1xf32>
    %77 = vector.broadcast %76 : vector<8x1xf32> to vector<8x8xf32>
    %78 = arith.mulf %73, %77 : vector<8x8xf32>
    %79 = arith.truncf %78 : vector<8x8xf32> to vector<8x8xbf16>
    %c1_47 = arith.constant 1 : index
    %c0_48 = arith.constant 0 : index
    %c0_49 = arith.constant 0 : index
    %80 = vector.load %arg18[%c1_47, %c0_48, %c0_49] : memref<4x8x8xbf16, #tpu.memory_space<vmem>>, vector<1x8x8xbf16>
    %81 = vector.shape_cast %80 : vector<1x8x8xbf16> to vector<8x8xbf16>
    %cst_50 = arith.constant dense<0.000000e+00> : vector<8x8xf32>
    %82 = tpu.matmul %79, %81, %cst_50 {dimension_numbers = #tpu.dot_dimension_numbers<[1], [0], [0], [1], [0, 0, 1, 1], [], []>} : vector<8x8xbf16>, vector<8x8xbf16>, vector<8x8xf32> -> vector<8x8xf32>
    %83 = vector.broadcast %7 : vector<8x1xf32> to vector<8x8xf32>
    %84 = arith.mulf %82, %83 : vector<8x8xf32>
    %85 = arith.truncf %84 : vector<8x8xf32> to vector<8x8xbf16>
    %c1_51 = arith.constant 1 : index
    %c0_52 = arith.constant 0 : index
    %c0_53 = arith.constant 0 : index
    %86 = vector.load %arg12[%c1_51, %c0_52, %c0_53] : memref<4x8x32xbf16, #tpu.memory_space<vmem>>, vector<1x8x32xbf16>
    %87 = vector.shape_cast %86 : vector<1x8x32xbf16> to vector<8x32xbf16>
    %cst_54 = arith.constant dense<0.000000e+00> : vector<8x32xf32>
    %88 = tpu.matmul %85, %87, %cst_54 {dimension_numbers = #tpu.dot_dimension_numbers<[1], [0], [0], [1], [0, 0, 1, 1], [], []>} : vector<8x8xbf16>, vector<8x32xbf16>, vector<8x32xf32> -> vector<8x32xf32>
    %89 = arith.addf %54, %88 : vector<8x32xf32>
    %c2 = arith.constant 2 : index
    %c0_55 = arith.constant 0 : index
    %c0_56 = arith.constant 0 : index
    %90 = vector.load %arg6[%c2, %c0_55, %c0_56] : memref<4x32x8xbf16, #tpu.memory_space<vmem>>, vector<1x32x8xbf16>
    %91 = vector.shape_cast %90 : vector<1x32x8xbf16> to vector<32x8xbf16>
    %cst_57 = arith.constant dense<0.000000e+00> : vector<8x8xf32>
    %92 = tpu.matmul %5, %91, %cst_57 {dimension_numbers = #tpu.dot_dimension_numbers<[1], [0], [0], [1], [0, 0, 1, 1], [], []>} : vector<8x32xbf16>, vector<32x8xbf16>, vector<8x8xf32> -> vector<8x8xf32>
    %c2_58 = arith.constant 2 : index
    %c0_59 = arith.constant 0 : index
    %c0_60 = arith.constant 0 : index
    %93 = vector.load %arg7[%c2_58, %c0_59, %c0_60] : memref<4x1x8xf32, #tpu.memory_space<vmem>>, vector<1x1x8xf32>
    %94 = vector.shape_cast %93 : vector<1x1x8xf32> to vector<1x8xf32>
    %95 = vector.broadcast %94 : vector<1x8xf32> to vector<8x8xf32>
    %96 = arith.addf %92, %95 : vector<8x8xf32>
    %cst_61 = arith.constant 0.353553385 : f32
    %97 = vector.broadcast %cst_61 : f32 to vector<8x8xf32>
    %98 = arith.mulf %96, %97 : vector<8x8xf32>
    %99 = arith.truncf %98 : vector<8x8xf32> to vector<8x8xbf16>
    %c2_62 = arith.constant 2 : index
    %c0_63 = arith.constant 0 : index
    %c0_64 = arith.constant 0 : index
    %100 = vector.load %arg17[%c2_62, %c0_63, %c0_64] : memref<4x8x8xbf16, #tpu.memory_space<vmem>>, vector<1x8x8xbf16>
    %101 = vector.shape_cast %100 : vector<1x8x8xbf16> to vector<8x8xbf16>
    %cst_65 = arith.constant dense<0.000000e+00> : vector<8x8xf32>
    %102 = tpu.matmul %99, %101, %cst_65 {dimension_numbers = #tpu.dot_dimension_numbers<[1], [1], [0], [0], [0, 0, 1, 0], [], []>} : vector<8x8xbf16>, vector<8x8xbf16>, vector<8x8xf32> -> vector<8x8xf32>
    %103 = arith.addf %102, %16 : vector<8x8xf32>
    %cst_66 = arith.constant dense<0xFF800000> : vector<8xf32>
    %104 = vector.multi_reduction <maximumf>, %103, %cst_66 [1] : vector<8x8xf32> to vector<8xf32>
    %105 = vector.shape_cast %104 : vector<8xf32> to vector<8x1xf32>
    %106 = vector.broadcast %105 : vector<8x1xf32> to vector<8x8xf32>
    %107 = arith.subf %103, %106 : vector<8x8xf32>
    %108 = math.exp %107 : vector<8x8xf32>
    %cst_67 = arith.constant dense<0.000000e+00> : vector<8xf32>
    %109 = vector.multi_reduction <add>, %108, %cst_67 [1] : vector<8x8xf32> to vector<8xf32>
    %110 = vector.shape_cast %109 : vector<8xf32> to vector<8x1xf32>
    %111 = tpu.reciprocal %110 {approx = true} : vector<8x1xf32> -> vector<8x1xf32>
    %112 = vector.broadcast %111 : vector<8x1xf32> to vector<8x8xf32>
    %113 = arith.mulf %108, %112 : vector<8x8xf32>
    %114 = arith.truncf %113 : vector<8x8xf32> to vector<8x8xbf16>
    %c2_68 = arith.constant 2 : index
    %c0_69 = arith.constant 0 : index
    %c0_70 = arith.constant 0 : index
    %115 = vector.load %arg18[%c2_68, %c0_69, %c0_70] : memref<4x8x8xbf16, #tpu.memory_space<vmem>>, vector<1x8x8xbf16>
    %116 = vector.shape_cast %115 : vector<1x8x8xbf16> to vector<8x8xbf16>
    %cst_71 = arith.constant dense<0.000000e+00> : vector<8x8xf32>
    %117 = tpu.matmul %114, %116, %cst_71 {dimension_numbers = #tpu.dot_dimension_numbers<[1], [0], [0], [1], [0, 0, 1, 1], [], []>} : vector<8x8xbf16>, vector<8x8xbf16>, vector<8x8xf32> -> vector<8x8xf32>
    %118 = vector.broadcast %7 : vector<8x1xf32> to vector<8x8xf32>
    %119 = arith.mulf %117, %118 : vector<8x8xf32>
    %120 = arith.truncf %119 : vector<8x8xf32> to vector<8x8xbf16>
    %c2_72 = arith.constant 2 : index
    %c0_73 = arith.constant 0 : index
    %c0_74 = arith.constant 0 : index
    %121 = vector.load %arg12[%c2_72, %c0_73, %c0_74] : memref<4x8x32xbf16, #tpu.memory_space<vmem>>, vector<1x8x32xbf16>
    %122 = vector.shape_cast %121 : vector<1x8x32xbf16> to vector<8x32xbf16>
    %cst_75 = arith.constant dense<0.000000e+00> : vector<8x32xf32>
    %123 = tpu.matmul %120, %122, %cst_75 {dimension_numbers = #tpu.dot_dimension_numbers<[1], [0], [0], [1], [0, 0, 1, 1], [], []>} : vector<8x8xbf16>, vector<8x32xbf16>, vector<8x32xf32> -> vector<8x32xf32>
    %124 = arith.addf %89, %123 : vector<8x32xf32>
    %c3 = arith.constant 3 : index
    %c0_76 = arith.constant 0 : index
    %c0_77 = arith.constant 0 : index
    %125 = vector.load %arg6[%c3, %c0_76, %c0_77] : memref<4x32x8xbf16, #tpu.memory_space<vmem>>, vector<1x32x8xbf16>
    %126 = vector.shape_cast %125 : vector<1x32x8xbf16> to vector<32x8xbf16>
    %cst_78 = arith.constant dense<0.000000e+00> : vector<8x8xf32>
    %127 = tpu.matmul %5, %126, %cst_78 {dimension_numbers = #tpu.dot_dimension_numbers<[1], [0], [0], [1], [0, 0, 1, 1], [], []>} : vector<8x32xbf16>, vector<32x8xbf16>, vector<8x8xf32> -> vector<8x8xf32>
    %c3_79 = arith.constant 3 : index
    %c0_80 = arith.constant 0 : index
    %c0_81 = arith.constant 0 : index
    %128 = vector.load %arg7[%c3_79, %c0_80, %c0_81] : memref<4x1x8xf32, #tpu.memory_space<vmem>>, vector<1x1x8xf32>
    %129 = vector.shape_cast %128 : vector<1x1x8xf32> to vector<1x8xf32>
    %130 = vector.broadcast %129 : vector<1x8xf32> to vector<8x8xf32>
    %131 = arith.addf %127, %130 : vector<8x8xf32>
    %cst_82 = arith.constant 0.353553385 : f32
    %132 = vector.broadcast %cst_82 : f32 to vector<8x8xf32>
    %133 = arith.mulf %131, %132 : vector<8x8xf32>
    %134 = arith.truncf %133 : vector<8x8xf32> to vector<8x8xbf16>
    %c3_83 = arith.constant 3 : index
    %c0_84 = arith.constant 0 : index
    %c0_85 = arith.constant 0 : index
    %135 = vector.load %arg17[%c3_83, %c0_84, %c0_85] : memref<4x8x8xbf16, #tpu.memory_space<vmem>>, vector<1x8x8xbf16>
    %136 = vector.shape_cast %135 : vector<1x8x8xbf16> to vector<8x8xbf16>
    %cst_86 = arith.constant dense<0.000000e+00> : vector<8x8xf32>
    %137 = tpu.matmul %134, %136, %cst_86 {dimension_numbers = #tpu.dot_dimension_numbers<[1], [1], [0], [0], [0, 0, 1, 0], [], []>} : vector<8x8xbf16>, vector<8x8xbf16>, vector<8x8xf32> -> vector<8x8xf32>
    %138 = arith.addf %137, %16 : vector<8x8xf32>
    %cst_87 = arith.constant dense<0xFF800000> : vector<8xf32>
    %139 = vector.multi_reduction <maximumf>, %138, %cst_87 [1] : vector<8x8xf32> to vector<8xf32>
    %140 = vector.shape_cast %139 : vector<8xf32> to vector<8x1xf32>
    %141 = vector.broadcast %140 : vector<8x1xf32> to vector<8x8xf32>
    %142 = arith.subf %138, %141 : vector<8x8xf32>
    %143 = math.exp %142 : vector<8x8xf32>
    %cst_88 = arith.constant dense<0.000000e+00> : vector<8xf32>
    %144 = vector.multi_reduction <add>, %143, %cst_88 [1] : vector<8x8xf32> to vector<8xf32>
    %145 = vector.shape_cast %144 : vector<8xf32> to vector<8x1xf32>
    %146 = tpu.reciprocal %145 {approx = true} : vector<8x1xf32> -> vector<8x1xf32>
    %147 = vector.broadcast %146 : vector<8x1xf32> to vector<8x8xf32>
    %148 = arith.mulf %143, %147 : vector<8x8xf32>
    %149 = arith.truncf %148 : vector<8x8xf32> to vector<8x8xbf16>
    %c3_89 = arith.constant 3 : index
    %c0_90 = arith.constant 0 : index
    %c0_91 = arith.constant 0 : index
    %150 = vector.load %arg18[%c3_89, %c0_90, %c0_91] : memref<4x8x8xbf16, #tpu.memory_space<vmem>>, vector<1x8x8xbf16>
    %151 = vector.shape_cast %150 : vector<1x8x8xbf16> to vector<8x8xbf16>
    %cst_92 = arith.constant dense<0.000000e+00> : vector<8x8xf32>
    %152 = tpu.matmul %149, %151, %cst_92 {dimension_numbers = #tpu.dot_dimension_numbers<[1], [0], [0], [1], [0, 0, 1, 1], [], []>} : vector<8x8xbf16>, vector<8x8xbf16>, vector<8x8xf32> -> vector<8x8xf32>
    %153 = vector.broadcast %7 : vector<8x1xf32> to vector<8x8xf32>
    %154 = arith.mulf %152, %153 : vector<8x8xf32>
    %155 = arith.truncf %154 : vector<8x8xf32> to vector<8x8xbf16>
    %c3_93 = arith.constant 3 : index
    %c0_94 = arith.constant 0 : index
    %c0_95 = arith.constant 0 : index
    %156 = vector.load %arg12[%c3_93, %c0_94, %c0_95] : memref<4x8x32xbf16, #tpu.memory_space<vmem>>, vector<1x8x32xbf16>
    %157 = vector.shape_cast %156 : vector<1x8x32xbf16> to vector<8x32xbf16>
    %cst_96 = arith.constant dense<0.000000e+00> : vector<8x32xf32>
    %158 = tpu.matmul %155, %157, %cst_96 {dimension_numbers = #tpu.dot_dimension_numbers<[1], [0], [0], [1], [0, 0, 1, 1], [], []>} : vector<8x8xbf16>, vector<8x32xbf16>, vector<8x32xf32> -> vector<8x32xf32>
    %159 = arith.addf %124, %158 : vector<8x32xf32>
    %c0_97 = arith.constant 0 : index
    %c0_98 = arith.constant 0 : index
    %160 = vector.load %arg14[%c0_97, %c0_98] : memref<1x32xf32, #tpu.memory_space<vmem>>, vector<1x32xf32>
    %c0_99 = arith.constant 0 : index
    %c0_100 = arith.constant 0 : index
    %161 = vector.load %arg15[%c0_99, %c0_100] : memref<1x32xf32, #tpu.memory_space<vmem>>, vector<1x32xf32>
    %cst_101 = arith.constant dense<0.000000e+00> : vector<8xf32>
    %162 = vector.multi_reduction <add>, %159, %cst_101 [1] : vector<8x32xf32> to vector<8xf32>
    %163 = vector.shape_cast %162 : vector<8xf32> to vector<8x1xf32>
    %cst_102 = arith.constant 3.200000e+01 : f32
    %164 = vector.broadcast %cst_102 : f32 to vector<8x1xf32>
    %165 = arith.divf %163, %164 : vector<8x1xf32>
    %166 = arith.mulf %159, %159 : vector<8x32xf32>
    %cst_103 = arith.constant dense<0.000000e+00> : vector<8xf32>
    %167 = vector.multi_reduction <add>, %166, %cst_103 [1] : vector<8x32xf32> to vector<8xf32>
    %168 = vector.shape_cast %167 : vector<8xf32> to vector<8x1xf32>
    %cst_104 = arith.constant 3.200000e+01 : f32
    %169 = vector.broadcast %cst_104 : f32 to vector<8x1xf32>
    %170 = arith.divf %168, %169 : vector<8x1xf32>
    %171 = arith.mulf %165, %165 : vector<8x1xf32>
    %172 = arith.subf %170, %171 : vector<8x1xf32>
    %cst_105 = arith.constant 1.000000e-07 : f32
    %173 = vector.broadcast %cst_105 : f32 to vector<8x1xf32>
    %174 = arith.addf %172, %173 : vector<8x1xf32>
    %175 = math.rsqrt %174 : vector<8x1xf32>
    %176 = vector.broadcast %165 : vector<8x1xf32> to vector<8x32xf32>
    %177 = arith.subf %159, %176 : vector<8x32xf32>
    %178 = vector.broadcast %175 : vector<8x1xf32> to vector<8x32xf32>
    %179 = arith.mulf %177, %178 : vector<8x32xf32>
    %180 = vector.broadcast %160 : vector<1x32xf32> to vector<8x32xf32>
    %181 = arith.mulf %179, %180 : vector<8x32xf32>
    %182 = vector.broadcast %161 : vector<1x32xf32> to vector<8x32xf32>
    %183 = arith.addf %181, %182 : vector<8x32xf32>
    %c0_106 = arith.constant 0 : index
    %c0_107 = arith.constant 0 : index
    %c0_108 = arith.constant 0 : index
    %184 = vector.load %arg16[%c0_106, %c0_107, %c0_108] : memref<1x8x32xf32, #tpu.memory_space<vmem>>, vector<1x8x32xf32>
    %185 = vector.shape_cast %184 : vector<1x8x32xf32> to vector<8x32xf32>
    %186 = vector.shape_cast %183 : vector<8x32xf32> to vector<1x8x32xf32>
    tpu.vector_store %arg16[%c0_106, %c0_107, %c0_108], %186 {strides = array<i32>} : memref<1x8x32xf32, #tpu.memory_space<vmem>>, vector<1x8x32xf32>,
    return
  }
  func.func @transform_0(%arg0: i32, %arg1: i32) -> (i32, i32, i32) {
    %c0_i32 = arith.constant 0 : i32
    %c0_i32_0 = arith.constant 0 : i32
    return %arg0, %arg1, %c0_i32 : i32, i32, i32
  }
  func.func @transform_1(%arg0: i32, %arg1: i32) -> (i32, i32, i32) {
    %c0_i32 = arith.constant 0 : i32
    %c0_i32_0 = arith.constant 0 : i32
    %c0_i32_1 = arith.constant 0 : i32
    return %arg0, %c0_i32, %c0_i32_0 : i32, i32, i32
  }
  func.func @transform_2(%arg0: i32, %arg1: i32) -> (i32, i32, i32) {
    %c0_i32 = arith.constant 0 : i32
    %c0_i32_0 = arith.constant 0 : i32
    return %arg0, %arg1, %c0_i32 : i32, i32, i32
  }
  func.func @transform_3(%arg0: i32, %arg1: i32) -> (i32, i32, i32) {
    %c0_i32 = arith.constant 0 : i32
    %c0_i32_0 = arith.constant 0 : i32
    %c0_i32_1 = arith.constant 0 : i32
    return %arg0, %c0_i32, %c0_i32_0 : i32, i32, i32
  }
  func.func @transform_4(%arg0: i32, %arg1: i32) -> (i32, i32, i32) {
    %c0_i32 = arith.constant 0 : i32
    %c0_i32_0 = arith.constant 0 : i32
    %c0_i32_1 = arith.constant 0 : i32
    %c0_i32_2 = arith.constant 0 : i32
    return %c0_i32, %c0_i32_0, %c0_i32_1 : i32, i32, i32
  }
  func.func @transform_5(%arg0: i32, %arg1: i32) -> (i32, i32, i32) {
    %c0_i32 = arith.constant 0 : i32
    %c0_i32_0 = arith.constant 0 : i32
    %c0_i32_1 = arith.constant 0 : i32
    %c0_i32_2 = arith.constant 0 : i32
    return %c0_i32, %c0_i32_0, %c0_i32_1 : i32, i32, i32
  }
  func.func @transform_6(%arg0: i32, %arg1: i32) -> (i32, i32, i32) {
    %c0_i32 = arith.constant 0 : i32
    %c0_i32_0 = arith.constant 0 : i32
    %c0_i32_1 = arith.constant 0 : i32
    %c0_i32_2 = arith.constant 0 : i32
    return %c0_i32, %c0_i32_0, %c0_i32_1 : i32, i32, i32
  }
  func.func @transform_7(%arg0: i32, %arg1: i32) -> (i32, i32, i32) {
    %c0_i32 = arith.constant 0 : i32
    %c0_i32_0 = arith.constant 0 : i32
    %c0_i32_1 = arith.constant 0 : i32
    %c0_i32_2 = arith.constant 0 : i32
    return %c0_i32, %c0_i32_0, %c0_i32_1 : i32, i32, i32
  }
  func.func @transform_8(%arg0: i32, %arg1: i32) -> (i32, i32, i32) {
    %c0_i32 = arith.constant 0 : i32
    %c0_i32_0 = arith.constant 0 : i32
    %c0_i32_1 = arith.constant 0 : i32
    %c0_i32_2 = arith.constant 0 : i32
    return %c0_i32, %c0_i32_0, %c0_i32_1 : i32, i32, i32
  }
  func.func @transform_9(%arg0: i32, %arg1: i32) -> (i32, i32, i32) {
    %c0_i32 = arith.constant 0 : i32
    %c0_i32_0 = arith.constant 0 : i32
    %c0_i32_1 = arith.constant 0 : i32
    %c0_i32_2 = arith.constant 0 : i32
    return %c0_i32, %c0_i32_0, %c0_i32_1 : i32, i32, i32
  }
  func.func @transform_10(%arg0: i32, %arg1: i32) -> (i32, i32, i32) {
    %c0_i32 = arith.constant 0 : i32
    %c0_i32_0 = arith.constant 0 : i32
    %c0_i32_1 = arith.constant 0 : i32
    %c0_i32_2 = arith.constant 0 : i32
    return %c0_i32, %c0_i32_0, %c0_i32_1 : i32, i32, i32
  }
  func.func @transform_11(%arg0: i32, %arg1: i32) -> (i32, i32) {
    %c0_i32 = arith.constant 0 : i32
    %c0_i32_0 = arith.constant 0 : i32
    %c0_i32_1 = arith.constant 0 : i32
    return %c0_i32, %c0_i32_0 : i32, i32
  }
  func.func @transform_12(%arg0: i32, %arg1: i32) -> (i32, i32) {
    %c0_i32 = arith.constant 0 : i32
    %c0_i32_0 = arith.constant 0 : i32
    %c0_i32_1 = arith.constant 0 : i32
    return %c0_i32, %c0_i32_0 : i32, i32
  }
  func.func @transform_13(%arg0: i32, %arg1: i32) -> (i32, i32) {
    %c0_i32 = arith.constant 0 : i32
    %c0_i32_0 = arith.constant 0 : i32
    %c0_i32_1 = arith.constant 0 : i32
    return %c0_i32, %c0_i32_0 : i32, i32
  }
  func.func @transform_14(%arg0: i32, %arg1: i32) -> (i32, i32, i32) {
    %c0_i32 = arith.constant 0 : i32
    %c0_i32_0 = arith.constant 0 : i32
    return %arg0, %arg1, %c0_i32 : i32, i32, i32
  }
}

</mosaic_0001>

<bundles_post_ra>
// kernel: tpu_custom_call.1
= control target key start
LH: loop header
LB: loop body
LE: loop exit
PB: predicated region body
PF: predicated region fallthrough
CT: control target
= control target key end

     0   :  { %s3242_s0 = inlined_call_operand.vmem [shape: f32[2,8,32], index: 0, kind: input, shape index: {}]   ;;  %s3243_s1 = inlined_call_operand.vmem [shape: f32[2,8,32], index: 1, kind: input, shape index: {}]   ;;  %s3244_s2 = inlined_call_operand.vmem [shape: f32[2,8,1], index: 2, kind: input, shape index: {}]   ;;  %s3245_s3 = inlined_call_operand.vmem [shape: f32[2,1,8], index: 3, kind: input, shape index: {}]   ;;  %s3246_s4 = inlined_call_operand.vmem [shape: bf16[4,32,8], index: 4, kind: input, shape index: {}]   ;;  %s3247_s5 = inlined_call_operand.vmem [shape: f32[4,1,8], index: 5, kind: input, shape index: {}]   ;;  %s3248_s6 = inlined_call_operand.vmem [shape: bf16[4,32,8], index: 6, kind: input, shape index: {}]   ;;  %s3249_s7 = inlined_call_operand.vmem [shape: f32[4,1,8], index: 7, kind: input, shape index: {}]   ;;  %s3250_s8 = inlined_call_operand.vmem [shape: bf16[4,32,8], index: 8, kind: input, shape index: {}]   ;;  %s3251_s9 = inlined_call_operand.vmem [shape: f32[4,1,8], index: 9, kind: input, shape index: {}]   ;;  %s3252_s10 = inlined_call_operand.vmem [shape: bf16[4,8,32], index: 10, kind: input, shape index: {}]   ;;  %s3253_s11 = inlined_call_operand.vmem [shape: f32[1,32], index: 11, kind: input, shape index: {}]   ;;  %s3254_s12 = inlined_call_operand.vmem [shape: f32[1,32], index: 12, kind: input, shape index: {}]   ;;  %s3255_s13 = inlined_call_operand.vmem [shape: f32[1,32], index: 13, kind: input, shape index: {}]   ;;  %s3256_s14 = inlined_call_operand.hbm [shape: f32[2,8,32], index: 14, kind: output, shape index: {}]  }
   0x1   :  { %3259 = sst [smem:[#allocation10_spill]] %s3242_s0 }
   0x2   :  { %3260 = sst [smem:[#allocation11_spill]] %s3243_s1 }
   0x3   :  { %3261 = sst [smem:[#allocation12_spill]] %s3244_s2 }
   0x4   :  { %19 = vsyncpa [#allocation5], 0 }
   0x5   :  { %21 = vsyncpa [#allocation5 + $0x1], 0  ;;  %s2810_s29 = smov 0   ;;  %s2812_s30 = smov 0  }
   0x6   :  { %s2814_s15 = smov 0   ;;  %s2816_s16 = smov 0  }
   0x7   :  { %s2818_s17 = smov 0   ;;  %s2820_s18 = smov 0  }
   0x8 LB: > { %3262 = sst [smem:[#allocation7_spill]] %s2725_s17  ;;  %s2183_s19 = sadd.s32 4294967295, %s2729_s18   ;;  %s2729_s18 = sphi %s2820_s18, %s27_s18   ;;  %s2725_s17 = sphi %s2818_s17, %s3272_s17   ;;  %s2721_s16 = sphi %s2816_s16, %s3271_s16   ;;  %s2717_s15 = sphi %s2814_s15, %s3275_s15   ;;  %s2713_s30 = sphi %s2812_s30, %s3274_s30   ;;  %s2709_s29 = sphi %s2810_s29, %s3273_s29  }
   0x9   : > { %s2184_s20 = sadd.s32 4294967294, %s2729_s18   ;;  %s39_s21 = sadd.s32 1, %s2725_s17 }
   0xa   : > { %s366_s22 = sadd.s32 1, %s2717_s15  ;;  %p41_p0 = scmp.ge.s32.totalorder %s39_s21, 2 }
   0xb   : > { %p376_p1 = scmp.ne.s32.totalorder %s2717_s15, %s2713_s30  ;;  %p377_p2 = scmp.eq.s32.totalorder %s2183_s19, 1 }
   0xc   : > { %p382_p3 = scmp.ne.s32.totalorder %s2713_s30, %s2709_s29  ;;  %s3277_s21 = smov (%p41_p0, %s39_s21), 0 }
   0xd   : > { %3263 = sst [smem:[#allocation8_spill]] %s3277_s21  ;;  %p2850_p4 = por %p377_p2, %p376_p1 }
   0xe   : > { %p383_p5 = scmp.eq.s32.totalorder %s2184_s20, 1  ;;  %s361_s24 = ssub.s32 %s2725_s17, %s3277_s21 }
   0xf   : > { %p2187_p6 = scmp.ge.s32.totalorder %s2729_s18, 1  ;;  %p364_p7 = scmp.eq.s32.totalorder %s361_s24, 0 }
  0x10   : > { %p2857_p8 = por %p383_p5, %p382_p3  ;;  %p464_p9 = scmp.lt.s32.totalorder %s2729_s18, 3 }
  0x11   : > { %s2863_s26 = scalar_select %p364_p7, %s2717_s15, %s366_s22  }
  0x12   : > { %p465_p10 = pnand %p2187_p6, %p464_p9 }
  0x13   : > { %3266 = sst [smem:[#allocation9_spill]] %s2863_s26  ;;  %v2609_v0 = vld [vmem:[%s3248_s6] sm:$0xff] (!%p465_p10)   ;;  %v2731_v1 = vmov (!%p465_p10), 0.0   ;;  %v2610_v2 = vld [vmem:[%s3248_s6 + $0x8] sm:$0xff] (!%p465_p10)   ;;  %vm2732_vm0 = vmmov (!%p465_p10), 0   ;;  %p526_p11 = scmp.lt.s32.totalorder (!%p465_p10), %s2721_s16, 1 }
  0x14   : > { %468 = sbr.rel (%p465_p10) target bundleno = 3696 (0xe70), region = 76  ;;  %2369 = vmatprep.subr.bf16.mxu0 (!%p465_p10), %v2731_v1  ;;  %2377 = vmatprep.subr.bf16.mxu1 (!%p465_p10), %v2731_v1  ;;  %s3267_s1 = sld [smem:[#allocation11_spill]] (!%p465_p10)  ;;  %vm577_vm1 = vcmask (!%p465_p10), 261120   ;;  %v2611_v4 = vld [vmem:[%s3248_s6 + $0x10] sm:$0xff] (!%p465_p10)   ;;  %v2619_v6 = vld [vmem:[%s3250_s8] sm:$0xff] (!%p465_p10)   ;;  %v2612_v7 = vld [vmem:[%s3248_s6 + $0x18] sm:$0xff] (!%p465_p10)  }
  0x15   : > { %2370 = vmatpush3.bf16.msra.mxu0 (!%p465_p10), %v2609_v0  ;;  %2373 = vmatprep.mubr.msk.bf16.mxu0 (!%p465_p10), %vm2732_vm0, %v2731_v1  ;;  %v2620_v8 = vld [vmem:[%s3250_s8 + $0x8] sm:$0xff] (!%p465_p10)   ;;  %v2613_v9 = vld [vmem:[%s3248_s6 + $0x20] sm:$0xff] (!%p465_p10)   ;;  %v2621_v10 = vld [vmem:[%s3250_s8 + $0x10] sm:$0xff] (!%p465_p10)   ;;  %s3268_s0 = sld [smem:[#allocation10_spill]] (!%p465_p10)  ;;  %s3269_s2 = sld [smem:[#allocation12_spill]] (!%p465_p10)  ;;  %v2733_v23 = vmov (!%p465_p10), 0  }
  0x16   : > { %2371 = vmatprep.subr.bf16.mxu0 (!%p465_p10), %v2731_v1  ;;  %2381 = vmatprep.mubr.msk.bf16.mxu1 (!%p465_p10), %vm2732_vm0, %v2731_v1  ;;  %v2614_v11 = vld [vmem:[%s3248_s6 + $0x28] sm:$0xff] (!%p465_p10)   ;;  %v2622_v12 = vld [vmem:[%s3250_s8 + $0x18] sm:$0xff] (!%p465_p10)   ;;  %v2615_v13 = vld [vmem:[%s3248_s6 + $0x30] sm:$0xff] (!%p465_p10)   ;;  %vm685_vm2 = vcmask (!%p465_p10), 60416   ;;  %vm1193_vm3 = vcmask (!%p465_p10), 64512   ;;  %vm1256_vm4 = vcmask (!%p465_p10), 1043456  }
  0x17   : > { %2378 = vmatpush3.bf16.msra.mxu1 (!%p465_p10), %v2619_v6  ;;  %v2623_v14 = vld [vmem:[%s3250_s8 + $0x20] sm:$0xff] (!%p465_p10)   ;;  %v2616_v15 = vld [vmem:[%s3248_s6 + $0x38] sm:$0xff] (!%p465_p10)   ;;  %v2624_v16 = vld [vmem:[%s3250_s8 + $0x28] sm:$0xff] (!%p465_p10)   ;;  %2608 = vset.pattern.permute.xlu0 (!%p465_p10), %v2733_v23  ;;  %s2306_s20 = sshll.u32 (!%p465_p10), %s2721_s16, 7 }
  0x18   : > { %2379 = vmatprep.subr.bf16.mxu1 (!%p465_p10), %v2731_v1  ;;  %v2617_v17 = vld [vmem:[%s3246_s4] sm:$0xff] (!%p465_p10)   ;;  %v2618_v18 = vld [vmem:[%s3246_s4 + $0x8] sm:$0xff] (!%p465_p10)   ;;  %v2625_v21 = vld [vmem:[%s3250_s8 + $0x30] sm:$0xff] (!%p465_p10)  }
  0x19   : > { %2372 = vmatpush3.bf16.msra.mxu0 (!%p465_p10), %v2610_v2  ;;  %v2626_v22 = vld [vmem:[%s3250_s8 + $0x38] sm:$0xff] (!%p465_p10)   ;;  %v2192_v25 = vld [vmem:[%s3249_s7] ss:$0 sm:$0xff] (!%p465_p10)  ;;  %v2205_v32 = vld [vmem:[%s3249_s7 + $0x1] ss:$0 sm:$0xff] (!%p465_p10) }
  0x1a   : > { %2385 = vmatprep.subr.bf16.mxu0 (!%p465_p10), %v2731_v1  ;;  %v2196_v34 = vld [vmem:[%s3251_s9] ss:$0 sm:$0xff] (!%p465_p10)  ;;  %v2223_v48 = vld [vmem:[%s3249_s7 + $0x2] ss:$0 sm:$0xff] (!%p465_p10)  ;;  %v2214_v50 = vld [vmem:[%s3251_s9 + $0x1] ss:$0 sm:$0xff] (!%p465_p10) }
  0x1b   : > { %s2880_s22 = scalar_select %p526_p11, %s2721_s16, 1  ;;  %2380 = vmatpush3.bf16.msra.mxu1 %v2620_v8  ;;  %v2241_v62 = vld [vmem:[%s3249_s7 + $0x3] ss:$0 sm:$0xff] }
  0x1c   : > { %2393 = vmatprep.subr.bf16.mxu1 %v2731_v1  ;;  %s2734_s16 = smov [#allocation4]  }
  0x1d   : > { %s2883_s24 = sshll.u32 %s2880_s22, 3 }
  0x1e   : > { %s536_s19 = scalar_lea.vmem %s3267_s1, %s2883_s24  ;;  %s532_s27 = scalar_lea.vmem %s3268_s0, %s2883_s24 }
  0x1f   : > { %v552_v3 = vld [vmem:[%s536_s19] sm:$0xff]  ;;  %s543_s28 = scalar_lea.vmem %s3269_s2, %s2883_s24  ;;  %s546_s1 = scalar_lea.vmem %s3245_s3, %s2880_s22 }
  0x20   : > { %v2893_v5 = vpack.c.bf16 %v552_v3, %v552_v3  ;;  %v2974_v19 = vld [vmem:[%s532_s27] sm:$0xff]  ;;  %s523_s19 = sand.u32 1, %s2713_s30   ;;  %s3194_s2 = scalar_lea.hbm %s3256_s14, %s2306_s20 }
  0x21   : > { %v2983_v20 = vpack.c.bf16 %v2974_v19, %v2974_v19  ;;  %v1099_v24 = vld [vmem:[%s543_s28] sm:$0xff]  ;;  %s2062_s22 = scalar_lea.sflag [#allocation5], %s523_s19 }
  0x22   : > { %2374 = vmatmul.mubr.msk.bf16.vlgmr.msra.gmra.mrb[0].mxu0 %vm577_vm1, %v2893_v5  ;;  %2382 = vmatmul.mubr.msk.bf16.vlgmr.msra.gmra.mrb[0].mxu1 %vm577_vm1, %v2893_v5  ;;  %v2232_v3 = vld [vmem:[%s3251_s9 + $0x2] ss:$0 sm:$0xff] }
  0x23   : > { %2386 = vmatpush3.bf16.msra.mxu0 %v2611_v4  ;;  %2389 = vmatprep.mubr.msk.bf16.mxu0 %vm2732_vm0, %v2731_v1 }
  0x24   : > { %2387 = vmatprep.subr.bf16.mxu0 %v2731_v1  ;;  %2394 = vmatpush3.bf16.msra.mxu1 %v2621_v10 }
  0x25   : > { %2397 = vmatprep.mubr.msk.bf16.mxu1 %vm2732_vm0, %v2731_v1  ;;  %2395 = vmatprep.subr.bf16.mxu1 %v2731_v1 }
  0x26   : > { %1103 = vperm.xlu0 %2608, %v1099_v24  }
  0x27   : > { %2388 = vmatpush3.bf16.msra.mxu0 %v2612_v7 }
  0x28   : > { %2401 = vmatprep.subr.bf16.mxu0 %v2731_v1  ;;  %2396 = vmatpush3.bf16.msra.mxu1 %v2622_v12 }
  0x29   : > { %2409 = vmatprep.subr.bf16.mxu1 %v2731_v1 }
  0x2a   : > { %2390 = vmatmul.mubr.msk.bf16.vlgmr.msra.gmra.mrb[4].mxu0 %vm577_vm1, %v2893_v5 }
  0x2b   : > { %2402 = vmatpush3.bf16.msra.mxu0 %v2613_v9  ;;  %2405 = vmatprep.mubr.msk.bf16.mxu0 %vm2732_vm0, %v2731_v1 }
  0x2c   : > { %2403 = vmatprep.subr.bf16.mxu0 %v2731_v1  ;;  %2398 = vmatmul.mubr.msk.bf16.vlgmr.msra.gmra.mrb[4].mxu1 %vm577_vm1, %v2893_v5 }
  0x2d   : > { %2410 = vmatpush3.bf16.msra.mxu1 %v2623_v14  ;;  %2413 = vmatprep.mubr.msk.bf16.mxu1 %vm2732_vm0, %v2731_v1 }
  0x2e   : > { %2411 = vmatprep.subr.bf16.mxu1 %v2731_v1 }
  0x2f   : > { %2404 = vmatpush3.bf16.msra.mxu0 %v2614_v11 }
  0x30   : > { %2417 = vmatprep.subr.bf16.mxu0 %v2731_v1 }
  0x31   : > { %2412 = vmatpush3.bf16.msra.mxu1 %v2624_v16 }
  0x32   : > { %2406 = vmatmul.mubr.msk.bf16.vlgmr.msra.gmra.mrb[8].mxu0 %vm577_vm1, %v2893_v5  ;;  %2425 = vmatprep.subr.bf16.mxu1 %v2731_v1 }
  0x33   : > { %2418 = vmatpush3.bf16.msra.mxu0 %v2615_v13  ;;  %2421 = vmatprep.mubr.msk.bf16.mxu0 %vm2732_vm0, %v2731_v1 }
  0x34   : > { %2419 = vmatprep.subr.bf16.mxu0 %v2731_v1  ;;  %2414 = vmatmul.mubr.msk.bf16.vlgmr.msra.gmra.mrb[8].mxu1 %vm577_vm1, %v2893_v5 }
  0x35   : > { %2429 = vmatprep.mubr.msk.bf16.mxu1 %vm2732_vm0, %v2731_v1  ;;  %2426 = vmatpush3.bf16.msra.mxu1 %v2625_v21 }
  0x36   : > { %2427 = vmatprep.subr.bf16.mxu1 %v2731_v1 }
  0x37   : > { %2420 = vmatpush3.bf16.msra.mxu0 %v2616_v15  ;;  %v2257_v15 = vld [vmem:[%s3247_s5] ss:$0 sm:$0xff] }
  0x38   : > { %2433 = vmatprep.subr.bf16.mxu0 %v2731_v1 }
  0x39   : > { %2428 = vmatpush3.bf16.msra.mxu1 %v2626_v22 }
  0x3a   : > { %2422 = vmatmul.mubr.msk.bf16.vlgmr.msra.gmra.mrb[12].mxu0 %vm577_vm1, %v2893_v5  ;;  %2441 = vmatprep.subr.bf16.mxu1 %v2731_v1 }
  0x3b   : > { %2434 = vmatpush3.bf16.msra.mxu0 %v2617_v17  ;;  %2437 = vmatprep.mubr.msk.bf16.mxu0 %vm2732_vm0, %v2731_v1 }
  0x3c   : > { %2435 = vmatprep.subr.bf16.mxu0 %v2731_v1  ;;  %2430 = vmatmul.mubr.msk.bf16.vlgmr.msra.gmra.mrb[12].mxu1 %vm577_vm1, %v2893_v5 }
  0x3d   : > { %2443 = vmatprep.mubr.msk.bf16.mxu1 %vm2732_vm0, %v2731_v1 }
  0x3f   : > { %2436 = vmatpush3.bf16.msra.mxu0 %v2618_v18 }
  0x40   : > { %2447 = vmatprep.subr.bf16.mxu0 %v2731_v1 }
  0x42   : > { %2438 = vmatmul.mubr.msk.bf16.vlgmr.msra.gmra.mrb[16].mxu0 %vm577_vm1, %v2983_v20 }
  0x43   : > { %2449 = vmatprep.mubr.msk.bf16.mxu0 %vm2732_vm0, %v2731_v1 }
  0xf5   : > { %v615_v26 = vpop.f32.mrb[0].mxu0  ;;  %v678_v38 = vpop.f32.mrb[0].mxu1 }
  0xf6   : > { %v616_v27 = vadd.f32 %v2192_v25, %v615_v26  ;;  %v2375_v28 = vpop.f32.mrb[1].mxu0  ;;  %v679_v41 = vadd.f32 %v2196_v34, %v678_v38  ;;  %v2383_v42 = vpop.f32.mrb[1].mxu1  ;;  %v2250_v25 = vld [vmem:[%s3251_s9 + $0x3] ss:$0 sm:$0xff] }
  0xf7   : > { %v618_v29 = vpop.f32.mrb[2].mxu0  ;;  %v681_v44 = vpop.f32.mrb[2].mxu1 }
  0xf8   : > { %v684_v30 = vpack.c.bf16 %v616_v27, %v616_v27  ;;  %v2376_v31 = vpop.f32.mrb[3].mxu0  ;;  %v687_v46 = vpack.c.bf16 %v679_v41, %v679_v41  ;;  %v2384_v47 = vpop.f32.mrb[3].mxu1 }
  0xfa   : > { %686 = vst.msk [vmem:[#allocation2] sm:$0xf] %vm685_vm2, %v684_v30  ;;  %688 = vst.msk [vmem:[#allocation3] sm:$0xf] %vm685_vm2, %v687_v46 }
  0xfd   : > { %v748_v33 = vpop.f32.mrb[4].mxu0 }
  0xfe   : > { %v749_v35 = vadd.f32 %v2205_v32, %v748_v33  ;;  %v2391_v36 = vpop.f32.mrb[5].mxu0  ;;  %v2254_v32 = vld [vmem:[%s546_s1] ss:$0 sm:$0xff]  ;;  %v3052_v33 = vpop.permute.xlu0 %1103  ;;  %s2188_s1 = sshll.u32 %s523_s19, 3 }
  0xff   : > { %v751_v37 = vpop.f32.mrb[6].mxu0  ;;  %v813_v54 = vpop.f32.mrb[4].mxu1  ;;  %v1112_v34 = vmul.f32 %v2254_v32, %v3052_v33  ;;  %s525_s27 = scalar_lea.vmem [#allocation4], %s2188_s1  ;;  %s2655_s1 = sshll.u32 %s2734_s16, 4  ;;  %s2656_s1 = int_to_ptr.vmem [resolvable:$false] %s2655_s1 }
 0x100   : > { %v819_v39 = vpack.c.bf16 %v749_v35, %v749_v35  ;;  %v2392_v40 = vpop.f32.mrb[7].mxu0  ;;  %v814_v57 = vadd.f32 %v2214_v50, %v813_v54  ;;  %v2399_v58 = vpop.f32.mrb[5].mxu1  ;;  %s2076_s28 = sshll.u32 %s525_s27, 4  ;;  %s2657_s24 = scalar_lea.vmem %s2656_s1, 256  ;;  %s3196_s28 = int_to_ptr.vmem [resolvable:$true] %s2076_s28 }
 0x101   : > { %v1192_v43 = vld [vmem:[#allocation2] sm:$0xf]  ;;  %v816_v59 = vpop.f32.mrb[6].mxu1  ;;  %v1252_v63 = vld [vmem:[#allocation3] sm:$0xf]  ;;  %v2255_v35 = vadd.f32 -1.0, %v1112_v34  ;;  %p2658_p1 = scmp.lt.s32.totalorder %s3196_s28, %s2656_s1 }
 0x102   : > { %821 = vst.msk [vmem:[#allocation2 + $0x4] sm:$0xf] %vm685_vm2, %v819_v39  ;;  %v1198_v45 = vsel %vm1193_vm3, %v1192_v43, 0  ;;  %v822_v60 = vpack.c.bf16 %v814_v57, %v814_v57  ;;  %v2400_v61 = vpop.f32.mrb[7].mxu1  ;;  %v1258_v0 = vsel %vm1256_vm4, %v1252_v63, 0  ;;  %s2651_s17 = scalar_lea.vmem %s3196_s28, 128 }
 0x103   : > { %2442 = vmatpush3.bf16.xpose.msra.mxu1 %v1198_v45  ;;  %2448 = vmatpush3.bf16.msra.mxu0 %v1258_v0  ;;  %v3055_v36 = vmul.f32 1e+30, %v2255_v35  ;;  %p2652_p12 = scmp.ne.s32.totalorder %s3196_s28, %s2651_s17  ;;  %p2659_p2 = scmp.lt.s32.totalorder %s2657_s24, %s2651_s17 }
 0x104   : > { %2453 = vmatprep.subr.bf16.mxu1 %v2731_v1  ;;  %824 = vst.msk [vmem:[#allocation3 + $0x4] sm:$0xf] %vm685_vm2, %v822_v60  ;;  %2459 = vmatprep.subr.bf16.mxu0 %v2731_v1 }
 0x105   : > { %v884_v49 = vpop.f32.mrb[8].mxu0  ;;  %p2653_p13 = pnand %p2652_p12, %p2850_p4  ;;  %p2660_p3 = por %p2659_p2, %p2658_p1 }
 0x106   : > { %v885_v51 = vadd.f32 %v2223_v48, %v884_v49  ;;  %v2407_v52 = vpop.f32.mrb[9].mxu0  ;;  %v1302_v48 = vld [vmem:[%s3252_s10] sm:$0xf] }
 0x107   : > { %v887_v53 = vpop.f32.mrb[10].mxu0  ;;  %v949_v7 = vpop.f32.mrb[8].mxu1  ;;  %v1307_v49 = vsel %vm1256_vm4, %v1302_v48, 0  ;;  %p2654_p0 = pneg %p2653_p13 }
 0x108   : > { %v955_v55 = vpack.c.bf16 %v885_v51, %v885_v51  ;;  %v2408_v56 = vpop.f32.mrb[11].mxu0  ;;  %v950_v10 = vadd.f32 %v2232_v3, %v949_v7  ;;  %v2415_v11 = vpop.f32.mrb[9].mxu1  ;;  %v2627_v53 = vld [vmem:[%s3246_s4 + $0x10] sm:$0xff]   ;;  %v2269_v3 = vld [vmem:[%s3247_s5 + $0x1] ss:$0 sm:$0xff] }
 0x109   : > { %v952_v12 = vpop.f32.mrb[10].mxu1  ;;  %p2661_p5 = pnand %p2660_p3, %p2654_p0 }
 0x10a   : > { %957 = vst.msk [vmem:[#allocation2 + $0x8] sm:$0xf] %vm685_vm2, %v955_v55  ;;  %v958_v13 = vpack.c.bf16 %v950_v10, %v950_v10  ;;  %v2416_v14 = vpop.f32.mrb[11].mxu1  ;;  %v2628_v55 = vld [vmem:[%s3246_s4 + $0x18] sm:$0xff]  }
 0x10b   : > { %v1478_v56 = vld [vmem:[#allocation3 + $0x4] sm:$0xf] }
 0x10c   : > { %960 = vst.msk [vmem:[#allocation3 + $0x8] sm:$0xf] %vm685_vm2, %v958_v13  ;;  %v1483_v57 = vsel %vm1256_vm4, %v1478_v56, 0 }
 0x10d   : > { %v1020_v2 = vpop.f32.mrb[12].mxu0 }
 0x10e   : > { %v1021_v4 = vadd.f32 %v2241_v62, %v1020_v2  ;;  %v2423_v5 = vpop.f32.mrb[13].mxu0  ;;  %v1418_v62 = vld [vmem:[#allocation2 + $0x4] sm:$0xf] }
 0x10f   : > { %v1023_v6 = vpop.f32.mrb[14].mxu0  ;;  %v1085_v26 = vpop.f32.mrb[12].mxu1  ;;  %v1423_v2 = vsel %vm1193_vm3, %v1418_v62, 0 }
 0x110   : > { %v1091_v8 = vpack.c.bf16 %v1021_v4, %v1021_v4  ;;  %v2424_v9 = vpop.f32.mrb[15].mxu0  ;;  %v1086_v27 = vadd.f32 %v2250_v25, %v1085_v26  ;;  %v2431_v28 = vpop.f32.mrb[13].mxu1 }
 0x111   : > { %v1088_v29 = vpop.f32.mrb[14].mxu1 }
 0x112   : > { %1093 = vst.msk [vmem:[#allocation2 + $0xc] sm:$0xf] %vm685_vm2, %v1091_v8  ;;  %v1094_v30 = vpack.c.bf16 %v1086_v27, %v1086_v27  ;;  %v2432_v31 = vpop.f32.mrb[15].mxu1  ;;  %v2629_v29 = vld [vmem:[%s3246_s4 + $0x20] sm:$0xff]  }
 0x113   : > { %v2630_v31 = vld [vmem:[%s3246_s4 + $0x28] sm:$0xff]   ;;  %v1704_v32 = vld [vmem:[#allocation3 + $0x8] sm:$0xf] }
 0x114   : > { %1096 = vst.msk [vmem:[#allocation3 + $0xc] sm:$0xf] %vm685_vm2, %v1094_v30  ;;  %v1709_v34 = vsel %vm1256_vm4, %v1704_v32, 0 }
 0x115   : > { %v1184_v16 = vpop.f32.mrb[16].mxu0 }
 0x116   : > { %v1185_v17 = vadd.f32 %v2257_v15, %v1184_v16  ;;  %v2439_v18 = vpop.f32.mrb[17].mxu0 }
 0x117   : > { %v1187_v21 = vpop.f32.mrb[18].mxu0 }
 0x118   : > { %v1190_v22 = vmul.f32 0.35355338, %v1185_v17  ;;  %v2440_v23 = vpop.f32.mrb[19].mxu0 }
 0x11a   : > { %v1191_v24 = vpack.c.bf16 %v1190_v22, %v1190_v22 }
 0x11c   : > { %2444 = vmatmul.mubr.msk.bf16.vlgmr.msra.gmra.mrb[16].mxu1 %vm1193_vm3, %v1191_v24  ;;  %v2275_v24 = vld [vmem:[%s3252_s10 + $0x4] sm:$0xf] }
 0x11d   : > { %2455 = vmatprep.mubr.msk.bf16.mxu1 %vm2732_vm0, %v2731_v1  ;;  %2454 = vmatpush3.bf16.msra.mxu1 %v1307_v49  ;;  %v1533_v25 = vsel %vm1256_vm4, %v2275_v24, 0 }
 0x11e   : > { %2467 = vmatprep.subr.bf16.mxu1 %v2731_v1 }
 0x1ef   : > { %v1234_v37 = vpop.f32.mrb[16].mxu1 }
 0x1f0   : > { %v1235_v38 = vadd.f32 %v1234_v37, %v3055_v36  ;;  %v2445_v39 = vpop.f32.mrb[17].mxu1 }
 0x1f1   : > { %v1237_v40 = vpop.f32.mrb[18].mxu1 }
 0x1f2   : > { %v2446_v41 = vpop.f32.mrb[19].mxu1  ;;  %v1240_v42 = vsel %vm1193_vm3, %v1235_v38, -inf  ;;  %v1644_v40 = vld [vmem:[#allocation2 + $0x8] sm:$0xf] }
 0x1f3   : > { %1241 = vmax.xlane.f32.xlu0 %v1240_v42 }
 0x280   : > { %v1242_v43 = vpop.xlane.xlu0 %1241 }
 0x281   : > { %v1243_v44 = vsub.f32 %v1235_v38, %v1242_v43  ;;  %v1649_v43 = vsel %vm1193_vm3, %v1644_v40, 0 }
 0x283   : > { %v1244_v45 = vmul.f32 1.442695, %v1243_v44  ;;  %v2282_v44 = vld [vmem:[%s3247_s5 + $0x2] ss:$0 sm:$0xff] }
 0x285   : > { %2633 = vpow2.f32 %v1244_v45 }
 0x28f   : > { %v2634_v46 = vpop.eup %2633 }
 0x290   : > { %v1246_v47 = vsel %vm1193_vm3, %v2634_v46, 0.0 }
 0x291   : > { %1247 = vadd.xlane.f32.xlu1 %v1246_v47 }
 0x31e   : > { %v1248_v50 = vpop.xlane.xlu1 %1247 }
 0x31f   : > { %2635 = vrcp.f32 %v1248_v50 }
 0x329   : > { %v2636_v51 = vpop.eup %2635 }
 0x32a   : > { %v1250_v52 = vmul.f32 %v2636_v51, %v2634_v46 }
 0x32c   : > { %v1251_v54 = vpack.c.bf16 %v1250_v52, %v1250_v52 }
 0x32e   : > { %2450 = vmatmul.mubr.msk.bf16.vlgmr.msra.gmra.mrb[20].mxu0 %vm1193_vm3, %v1251_v54 }
 0x32f   : > { %2460 = vmatpush3.bf16.msra.mxu0 %v2627_v53  ;;  %2463 = vmatprep.mubr.msk.bf16.mxu0 %vm2732_vm0, %v2731_v1 }
 0x330   : > { %2461 = vmatprep.subr.bf16.mxu0 %v2731_v1 }
 0x333   : > { %2462 = vmatpush3.bf16.msra.mxu0 %v2628_v55 }
 0x334   : > { %2473 = vmatprep.subr.bf16.mxu0 %v2731_v1 }
 0x336   : > { %2464 = vmatmul.mubr.msk.bf16.vlgmr.msra.gmra.mrb[24].mxu0 %vm577_vm1, %v2983_v20 }
 0x337   : > { %2474 = vmatpush3.bf16.msra.mxu0 %v1483_v57  ;;  %2475 = vmatprep.mubr.msk.bf16.mxu0 %vm2732_vm0, %v2731_v1 }
 0x338   : > { %2485 = vmatprep.subr.bf16.mxu0 %v2731_v1 }
 0x401   : > { %v1294_v58 = vpop.f32.mrb[20].mxu0 }
 0x402   : > { %v1300_v59 = vmul.f32 %v1294_v58, %v3052_v33  ;;  %v2451_v60 = vpop.f32.mrb[21].mxu0 }
 0x403   : > { %v1297_v61 = vpop.f32.mrb[22].mxu0 }
 0x404   : > { %v1301_v63 = vpack.c.bf16 %v1300_v59, %v1300_v59  ;;  %v2452_v0 = vpop.f32.mrb[23].mxu0 }
 0x406   : > { %2456 = vmatmul.mubr.msk.bf16.vlgmr.msra.gmra.mrb[20].mxu1 %vm1193_vm3, %v1301_v63  ;;  %v2288_v63 = vld [vmem:[%s3252_s10 + $0x8] sm:$0xf] }
 0x407   : > { %2468 = vmatpush3.bf16.xpose.msra.mxu1 %v1423_v2  ;;  %2469 = vmatprep.mubr.msk.bf16.mxu1 %vm2732_vm0, %v2731_v1  ;;  %v1759_v0 = vsel %vm1256_vm4, %v2288_v63, 0 }
 0x408   : > { %2479 = vmatprep.subr.bf16.mxu1 %v2731_v1 }
 0x409   : > { %v1409_v4 = vpop.f32.mrb[24].mxu0 }
 0x40a   : > { %v1410_v5 = vadd.f32 %v2269_v3, %v1409_v4  ;;  %v2465_v6 = vpop.f32.mrb[25].mxu0 }
 0x40b   : > { %v1412_v7 = vpop.f32.mrb[26].mxu0 }
 0x40c   : > { %v1415_v8 = vmul.f32 0.35355338, %v1410_v5  ;;  %v2466_v9 = vpop.f32.mrb[27].mxu0  ;;  %v2631_v5 = vld [vmem:[%s3246_s4 + $0x30] sm:$0xff]   ;;  %v2632_v7 = vld [vmem:[%s3246_s4 + $0x38] sm:$0xff]  }
 0x40e   : > { %v1416_v10 = vpack.c.bf16 %v1415_v8, %v1415_v8  ;;  %v1930_v8 = vld [vmem:[#allocation3 + $0xc] sm:$0xf] }
 0x40f   : > { %v1935_v9 = vsel %vm1256_vm4, %v1930_v8, 0 }
 0x410   : > { %2470 = vmatmul.mubr.msk.bf16.vlgmr.msra.gmra.mrb[24].mxu1 %vm1193_vm3, %v1416_v10 }
 0x411   : > { %2481 = vmatprep.mubr.msk.bf16.mxu1 %vm2732_vm0, %v2731_v1  ;;  %2480 = vmatpush3.bf16.msra.mxu1 %v1533_v25 }
 0x412   : > { %2493 = vmatprep.subr.bf16.mxu1 %v2731_v1 }
 0x4e3   : > { %v1459_v11 = vpop.f32.mrb[24].mxu1 }
 0x4e4   : > { %v1460_v12 = vadd.f32 %v1459_v11, %v3055_v36  ;;  %v2471_v13 = vpop.f32.mrb[25].mxu1 }
 0x4e5   : > { %v1462_v14 = vpop.f32.mrb[26].mxu1 }
 0x4e6   : > { %v2472_v15 = vpop.f32.mrb[27].mxu1  ;;  %v1465_v16 = vsel %vm1193_vm3, %v1460_v12, -inf  ;;  %v1870_v14 = vld [vmem:[#allocation2 + $0xc] sm:$0xf] }
 0x4e7   : > { %1466 = vmax.xlane.f32.xlu1 %v1465_v16 }
 0x574   : > { %v1467_v17 = vpop.xlane.xlu1 %1466 }
 0x575   : > { %v1468_v18 = vsub.f32 %v1460_v12, %v1467_v17  ;;  %v1875_v17 = vsel %vm1193_vm3, %v1870_v14, 0 }
 0x577   : > { %v1469_v21 = vmul.f32 1.442695, %v1468_v18 }
 0x579   : > { %2637 = vpow2.f32 %v1469_v21 }
 0x583   : > { %v2638_v22 = vpop.eup %2637 }
 0x584   : > { %v1471_v23 = vsel %vm1193_vm3, %v2638_v22, 0.0 }
 0x585   : > { %1472 = vadd.xlane.f32.xlu1 %v1471_v23 }
 0x612   : > { %v1473_v26 = vpop.xlane.xlu1 %1472 }
 0x613   : > { %2639 = vrcp.f32 %v1473_v26 }
 0x61d   : > { %v2640_v27 = vpop.eup %2639 }
 0x61e   : > { %v1475_v28 = vmul.f32 %v2640_v27, %v2638_v22 }
 0x620   : > { %v1476_v30 = vpack.c.bf16 %v1475_v28, %v1475_v28 }
 0x622   : > { %2476 = vmatmul.mubr.msk.bf16.vlgmr.msra.gmra.mrb[28].mxu0 %vm1193_vm3, %v1476_v30 }
 0x623   : > { %2486 = vmatpush3.bf16.msra.mxu0 %v2629_v29  ;;  %2489 = vmatprep.mubr.msk.bf16.mxu0 %vm2732_vm0, %v2731_v1 }
 0x624   : > { %2487 = vmatprep.subr.bf16.mxu0 %v2731_v1 }
 0x627   : > { %2488 = vmatpush3.bf16.msra.mxu0 %v2630_v31 }
 0x628   : > { %2499 = vmatprep.subr.bf16.mxu0 %v2731_v1 }
 0x62a   : > { %2490 = vmatmul.mubr.msk.bf16.vlgmr.msra.gmra.mrb[32].mxu0 %vm577_vm1, %v2983_v20 }
 0x62b   : > { %2500 = vmatpush3.bf16.msra.mxu0 %v1709_v34  ;;  %2501 = vmatprep.mubr.msk.bf16.mxu0 %vm2732_vm0, %v2731_v1 }
 0x62c   : > { %2511 = vmatprep.subr.bf16.mxu0 %v2731_v1 }
 0x6f5   : > { %v1519_v35 = vpop.f32.mrb[28].mxu0 }
 0x6f6   : > { %v1525_v37 = vmul.f32 %v1519_v35, %v3052_v33  ;;  %v2477_v38 = vpop.f32.mrb[29].mxu0 }
 0x6f7   : > { %v1522_v39 = vpop.f32.mrb[30].mxu0 }
 0x6f8   : > { %v1526_v41 = vpack.c.bf16 %v1525_v37, %v1525_v37  ;;  %v2478_v42 = vpop.f32.mrb[31].mxu0 }
 0x6fa   : > { %2482 = vmatmul.mubr.msk.bf16.vlgmr.msra.gmra.mrb[20].mxu1 %vm1193_vm3, %v1526_v41 }
 0x6fb   : > { %2494 = vmatpush3.bf16.xpose.msra.mxu1 %v1649_v43  ;;  %2495 = vmatprep.mubr.msk.bf16.mxu1 %vm2732_vm0, %v2731_v1 }
 0x6fc   : > { %2505 = vmatprep.subr.bf16.mxu1 %v2731_v1 }
 0x6fd   : > { %v1635_v45 = vpop.f32.mrb[32].mxu0 }
 0x6fe   : > { %v1636_v46 = vadd.f32 %v2282_v44, %v1635_v45  ;;  %v2491_v47 = vpop.f32.mrb[33].mxu0 }
 0x6ff   : > { %v1638_v48 = vpop.f32.mrb[34].mxu0 }
 0x700   : > { %v1641_v49 = vmul.f32 0.35355338, %v1636_v46  ;;  %v2492_v50 = vpop.f32.mrb[35].mxu0 }
 0x701   : > { %v2256_v50 = vld [vmem:[%s3253_s11] ss:$0 sm:$0xff] }
 0x702   : > { %v1642_v51 = vpack.c.bf16 %v1641_v49, %v1641_v49 }
 0x704   : > { %2496 = vmatmul.mubr.msk.bf16.vlgmr.msra.gmra.mrb[28].mxu1 %vm1193_vm3, %v1642_v51  ;;  %v1122_v51 = vadd.f32 %v2256_v50, %v2974_v19 }
 0x705   : > { %2507 = vmatprep.mubr.msk.bf16.mxu1 %vm2732_vm0, %v2731_v1  ;;  %2506 = vmatpush3.bf16.msra.mxu1 %v1759_v0 }
 0x706   : > { %2519 = vmatprep.subr.bf16.mxu1 %v2731_v1 }
 0x7d7   : > { %v1685_v52 = vpop.f32.mrb[28].mxu1 }
 0x7d8   : > { %v1686_v53 = vadd.f32 %v1685_v52, %v3055_v36  ;;  %v2497_v54 = vpop.f32.mrb[29].mxu1 }
 0x7d9   : > { %v1688_v55 = vpop.f32.mrb[30].mxu1 }
 0x7da   : > { %v2498_v56 = vpop.f32.mrb[31].mxu1  ;;  %v1691_v57 = vsel %vm1193_vm3, %v1686_v53, -inf }
 0x7db   : > { %1692 = vmax.xlane.f32.xlu1 %v1691_v57 }
 0x868   : > { %v1693_v58 = vpop.xlane.xlu1 %1692 }
 0x869   : > { %v1694_v59 = vsub.f32 %v1686_v53, %v1693_v58 }
 0x86b   : > { %v1695_v60 = vmul.f32 1.442695, %v1694_v59 }
 0x86d   : > { %2641 = vpow2.f32 %v1695_v60 }
 0x877   : > { %v2642_v61 = vpop.eup %2641 }
 0x878   : > { %v1697_v62 = vsel %vm1193_vm3, %v2642_v61, 0.0 }
 0x879   : > { %1698 = vadd.xlane.f32.xlu1 %v1697_v62 }
 0x906   : > { %v1699_v2 = vpop.xlane.xlu1 %1698 }
 0x907   : > { %2643 = vrcp.f32 %v1699_v2 }
 0x911   : > { %v2644_v3 = vpop.eup %2643 }
 0x912   : > { %v1701_v4 = vmul.f32 %v2644_v3, %v2642_v61 }
 0x914   : > { %v1702_v6 = vpack.c.bf16 %v1701_v4, %v1701_v4  ;;  %v2303_v4 = vld [vmem:[%s3254_s12] ss:$0 sm:$0xff] }
 0x916   : > { %2502 = vmatmul.mubr.msk.bf16.vlgmr.msra.gmra.mrb[36].mxu0 %vm1193_vm3, %v1702_v6  ;;  %v2304_v6 = vld [vmem:[%s3255_s13] ss:$0 sm:$0xff] }
 0x917   : > { %2512 = vmatpush3.bf16.msra.mxu0 %v2631_v5  ;;  %2515 = vmatprep.mubr.msk.bf16.mxu0 %vm2732_vm0, %v2731_v1 }
 0x918   : > { %2513 = vmatprep.subr.bf16.mxu0 %v2731_v1 }
 0x91b   : > { %2514 = vmatpush3.bf16.msra.mxu0 %v2632_v7 }
 0x91c   : > { %2525 = vmatprep.subr.bf16.mxu0 %v2731_v1 }
 0x91e   : > { %2516 = vmatmul.mubr.msk.bf16.vlgmr.msra.gmra.mrb[40].mxu0 %vm577_vm1, %v2983_v20  ;;  %v2295_v20 = vld [vmem:[%s3247_s5 + $0x3] ss:$0 sm:$0xff] }
 0x91f   : > { %2526 = vmatpush3.bf16.msra.mxu0 %v1935_v9  ;;  %2527 = vmatprep.mubr.msk.bf16.mxu0 %vm2732_vm0, %v2731_v1 }
 0x9e9   : > { %v1745_v10 = vpop.f32.mrb[36].mxu0 }
 0x9ea   : > { %v1751_v11 = vmul.f32 %v1745_v10, %v3052_v33  ;;  %v2503_v12 = vpop.f32.mrb[37].mxu0 }
 0x9eb   : > { %v1748_v13 = vpop.f32.mrb[38].mxu0 }
 0x9ec   : > { %v1752_v15 = vpack.c.bf16 %v1751_v11, %v1751_v11  ;;  %v2504_v16 = vpop.f32.mrb[39].mxu0 }
 0x9ee   : > { %2508 = vmatmul.mubr.msk.bf16.vlgmr.msra.gmra.mrb[20].mxu1 %vm1193_vm3, %v1752_v15 }
 0x9ef   : > { %2520 = vmatpush3.bf16.xpose.msra.mxu1 %v1875_v17  ;;  %2521 = vmatprep.mubr.msk.bf16.mxu1 %vm2732_vm0, %v2731_v1 }
 0x9f0   : > { %2531 = vmatprep.subr.bf16.mxu1 %v2731_v1 }
 0x9f1   : > { %v1861_v18 = vpop.f32.mrb[40].mxu0 }
 0x9f2   : > { %v1862_v21 = vadd.f32 %v2295_v20, %v1861_v18  ;;  %v2517_v22 = vpop.f32.mrb[41].mxu0 }
 0x9f3   : > { %v1864_v23 = vpop.f32.mrb[42].mxu0 }
 0x9f4   : > { %v1867_v24 = vmul.f32 0.35355338, %v1862_v21  ;;  %v2518_v25 = vpop.f32.mrb[43].mxu0 }
 0x9f6   : > { %v1868_v26 = vpack.c.bf16 %v1867_v24, %v1867_v24 }
 0x9f8   : > { %2522 = vmatmul.mubr.msk.bf16.vlgmr.msra.gmra.mrb[32].mxu1 %vm1193_vm3, %v1868_v26 }
 0x9f9   : > { %2533 = vmatprep.mubr.msk.bf16.mxu1 %vm2732_vm0, %v2731_v1  ;;  %v2301_v1 = vld [vmem:[%s3252_s10 + $0xc] sm:$0xf] }
 0xacb   : > { %v1911_v27 = vpop.f32.mrb[32].mxu1 }
 0xacc   : > { %v1912_v28 = vadd.f32 %v1911_v27, %v3055_v36  ;;  %v2523_v29 = vpop.f32.mrb[33].mxu1  ;;  %v1985_v36 = vsel %vm1256_vm4, %v2301_v1, 0 }
 0xacd   : > { %v1914_v30 = vpop.f32.mrb[34].mxu1  ;;  %2532 = vmatpush3.bf16.msra.mxu1 %v1985_v36 }
 0xace   : > { %v2524_v31 = vpop.f32.mrb[35].mxu1  ;;  %v1917_v32 = vsel %vm1193_vm3, %v1912_v28, -inf }
 0xacf   : > { %1918 = vmax.xlane.f32.xlu1 %v1917_v32 }
 0xb5c   : > { %v1919_v34 = vpop.xlane.xlu1 %1918 }
 0xb5d   : > { %v1920_v35 = vsub.f32 %v1912_v28, %v1919_v34 }
 0xb5f   : > { %v1921_v37 = vmul.f32 1.442695, %v1920_v35 }
 0xb61   : > { %2645 = vpow2.f32 %v1921_v37 }
 0xb6b   : > { %v2646_v38 = vpop.eup %2645 }
 0xb6c   : > { %v1923_v39 = vsel %vm1193_vm3, %v2646_v38, 0.0 }
 0xb6d   : > { %1924 = vadd.xlane.f32.xlu1 %v1923_v39 }
 0xbfa   : > { %v1925_v40 = vpop.xlane.xlu1 %1924 }
 0xbfb   : > { %2647 = vrcp.f32 %v1925_v40 }
 0xc05   : > { %v2648_v41 = vpop.eup %2647 }
 0xc06   : > { %v1927_v42 = vmul.f32 %v2648_v41, %v2646_v38 }
 0xc08   : > { %v1928_v43 = vpack.c.bf16 %v1927_v42, %v1927_v42 }
 0xc0a   : > { %2528 = vmatmul.mubr.msk.bf16.vlgmr.msra.gmra.mrb[44].mxu0 %vm1193_vm3, %v1928_v43 }
 0xcdd   : > { %v1971_v44 = vpop.f32.mrb[44].mxu0 }
 0xcde   : > { %v1977_v45 = vmul.f32 %v1971_v44, %v3052_v33  ;;  %v2529_v46 = vpop.f32.mrb[45].mxu0 }
 0xcdf   : > { %v1974_v47 = vpop.f32.mrb[46].mxu0 }
 0xce0   : > { %v1978_v48 = vpack.c.bf16 %v1977_v45, %v1977_v45  ;;  %v2530_v49 = vpop.f32.mrb[47].mxu0 }
 0xce2   : > { %2534 = vmatmul.mubr.msk.bf16.vlgmr.msra.gmra.mrb[20].mxu1 %vm1193_vm3, %v1978_v48 }
 0xdb5   : > { %v2021_v52 = vpop.f32.mrb[20].mxu1 }
 0xdb6   : > { %v2537_v53 = vadd.f32 %v2021_v52, %v1122_v51  ;;  %v2535_v54 = vpop.f32.mrb[21].mxu1 }
 0xdb7   : > { %v2024_v55 = vpop.f32.mrb[22].mxu1 }
 0xdb8   : > { %v2536_v56 = vpop.f32.mrb[23].mxu1  ;;  %v2030_v33 = vsel %vm577_vm1, %v2537_v53, 0.0  ;;  %v2035_v57 = vmul.f32 %v2537_v53, %v2537_v53 }
 0xdb9   : > { %2031 = vadd.xlane.f32.xlu1 %v2030_v33 }
 0xdba   : > { %v2036_v58 = vsel %vm577_vm1, %v2035_v57, 0.0 }
 0xdbd   : > { %2037 = vadd.xlane.f32.xlu1 %v2036_v58 }
 0xe46   : > { %v2032_v59 = vpop.xlane.xlu1 %2031 }
 0xe47   : > { %v2034_v60 = vmul.f32 0.03125, %v2032_v59 }
 0xe49   : > { %v2040_v62 = vmul.f32 %v2034_v60, %v2034_v60  ;;  %v2044_v2 = vsub.f32 %v2537_v53, %v2034_v60 }
 0xe4a   : > { %v2038_v61 = vpop.xlane.xlu1 %2037 }
 0xe4b   : > { %v2039_v63 = vmul.f32 0.03125, %v2038_v61 }
 0xe4d   : > { %v2041_v19 = vsub.f32 %v2039_v63, %v2040_v62 }
 0xe4f   : > { %v2042_v0 = vadd.f32 1e-07, %v2041_v19 }
 0xe51   : > { %2649 = vrsqrt.f32 %v2042_v0 }
 0xe5b   : > { %v2650_v3 = vpop.eup %2649 }
 0xe5c   : > { %v2045_v5 = vmul.f32 %v2650_v3, %v2044_v2 }
 0xe5e   : > { %v2052_v7 = vmul.f32 %v2303_v4, %v2045_v5 }
 0xe60   : > { %v2059_v8 = vadd.f32 %v2304_v6, %v2052_v7 }
 0xe62   : > { %2060 = vst.msk [vmem:[%s525_s27] sm:$0xff] %vm577_vm1, %v2059_v8 }
 0xe63   : > { %2664 = shalt.err (!%p2661_p5)
}
 0xe64   : > { %s2665_s0 = scalar_lea.hbm %s3194_s2, 128  ;;  %s2669_s20 = scalar_lea.hbm %s3256_s14, 256 }
 0xe65   : > { %p2666_p6 = scmp.ne.s32.totalorder %s3194_s2, %s2665_s0  ;;  %p2670_p10 = scmp.lt.u32.totalorder %s3194_s2, %s3256_s14 }
 0xe66   : > { %p2671_p11 = scmp.lt.u32.totalorder %s2669_s20, %s2665_s0  ;;  %p2673_p13 = scmp.lt.u32.totalorder %s2665_s0, %s3194_s2 }
 0xe67   : > { %p2667_p7 = pnand %p2666_p6, %p2850_p4 }
 0xe68   : > { %p2672_p12 = por %p2671_p11, %p2670_p10 }
 0xe69   : > { %p2668_p9 = pneg %p2667_p7 }
 0xe6a   : > { %p2674_p0 = por %p2673_p13, %p2672_p12 }
 0xe6c   : > { %p2675_p1 = pnand %p2674_p0, %p2668_p9 }
 0xe6e   : > { %2678 = shalt.err (!%p2675_p1)
}
 0xe6f   : > { %2550 = dma.vmem_to_hbm [thread:$0]  (%p2850_p4), %s3196_s28, 128, %s3194_s2, %s2062_s22  }
 0xe70 PF: > { %p2556_p2 = scmp.ge.s32.totalorder %s2729_s18, 2  ;;  %s2088_s17 = sand.u32 1, %s2709_s29  }
 0xe71   : > { %s2089_s16 = scalar_lea.sflag [#allocation5], %s2088_s17 }
 0xe72   : > { %p2553_p3 = pnand %p2556_p2, %p2857_p8 }
 0xe74   : > { %2704 = dma.done.wait (!%p2553_p3), %s2089_s16, 128  }
 0xe75   : > { %2706 = vsyncadd (!%p2553_p3), %s2089_s16, 4294967168  ;;  %s27_s18 = sadd.s32 1, %s2729_s18   ;;  %s3270_s23 = sld [smem:[#allocation9_spill]] }
 0xe76   : > { %p24_p5 = scmp.ge.s32.totalorder %s27_s18, 4   ;;  %s3271_s16 = sld [smem:[#allocation7_spill]] }
 0xe77   : > { %s3272_s17 = sld [smem:[#allocation8_spill]]  ;;  %s3273_s29 = smov %s2713_s30 }
 0xe78   : > { %s3274_s30 = smov %s2717_s15  ;;  %26 = sbr.rel (!%p24_p5) target bundleno = 8 (0x8), region = 157 }
 0xe7b   : > { %s3275_s15 = smov %s3270_s23 }
 0xe7f   :  { %2094 = vsyncpa [#allocation5], 1 }
 0xe80   :  { %2096 = vsyncpa [#allocation5 + $0x1], 1 }

</bundles_post_ra>
